<compile_context>
chip_gen: v7x
topology: tpu7x:2x2x1
jax: 0.10.0
libtpu: 0.0.40
codegen_flags: <defaults>
</compile_context>

<pallas_src>
import functools

import jax
import jax.numpy as jnp
from jax.experimental import pallas as pl
from jax.experimental.pallas import tpu as pltpu

EPS = 1e-15
_LANE = 128
_VMEM_LIMIT_BYTES = 32 * 1024 * 1024   # safe on v5e/v6e (128 MiB) and v7x (64 MiB)


def _round_up(x, m):
    return ((x + m - 1) // m) * m


def _pad2d(a, rows, cols, dtype=None):
    r, c = a.shape
    out = jnp.pad(a, ((0, rows - r), (0, cols - c)))
    return out.astype(dtype) if dtype is not None else out


def _node_tiles(n, tile_n):
    """Pick a node tile: multiple of 128 lanes (lane-dense discriminator
    stores), clamped so the grid keeps >= 2 steps for v7x's 2 TensorCores."""
    half = _round_up(-(-n // 2), _LANE)
    tn = max(_LANE, min(tile_n, half))
    n_pad = _round_up(n, tn)
    return tn, n_pad, n_pad // tn


def _softplus(x):
    # Stable softplus: log(1 + exp(x)) without overflow (EUP exp/log).
    return jnp.maximum(x, 0.0) + jnp.log1p(jnp.exp(-jnp.abs(x)))


# -----------------------------------------------------------------------------
# Pallas kernels
# -----------------------------------------------------------------------------
def _dgi_encode_kernel(x_ref, w_ref, b_ref, pos_ref, part_ref, *,
                       n_valid, tile_n, mask_rows):
    """Per node-tile: pos = relu(x @ W + b) (bf16 out) + f32 feature-sum partial."""
    # In-kernel bf16 cast rides the tile DMA (no separate wrapper cast pass).
    x = x_ref[...].astype(jnp.bfloat16)
    pos = jnp.dot(x, w_ref[...], preferred_element_type=jnp.float32)
    pos = jnp.maximum(pos + b_ref[...], 0.0)

    if mask_rows:  # zero padded rows (only emitted when N % tile_n != 0)
        row = jax.lax.broadcasted_iota(jnp.int32, (tile_n, 1), 0)
        remaining = n_valid - pl.program_id(0) * tile_n
        pos = jnp.where(row < remaining, pos, 0.0)

    pos_ref[...] = pos.astype(pos_ref.dtype)            # bf16 writeback

    # Partial node-sum (f32, pre-cast) for the summary readout -> (1, Hp),
    # broadcast across 8 sublanes so the (1, 8, Hp) store is a full tile.
    psum = jnp.sum(pos, axis=0, keepdims=True)
    part_ref[...] = jnp.broadcast_to(psum[None, :, :], part_ref.shape)


def _dgi_discriminate_loss_kernel(pos_ref, ws_ref, prob_ref, lpos_ref, lneg_ref, *,
                                  n_valid, tile_n, mask_lanes):
    """sigmoid(z @ ws) lane-dense + fused per-tile loss partial sums.

    ws is pre-broadcast to (8, Hp) bf16; the logits come out as (8, TILE_N) so
    the node dimension maps to lanes (full, unmasked vst).  Row 0 is the answer.
    Loss terms use softplus (== -log sigmoid) instead of log(sigmoid + EPS).
    """
    dn = (((1,), (1,)), ((), ()))                        # contract feature dims
    v = jax.lax.dot_general(ws_ref[...], pos_ref[...], dn,
                            preferred_element_type=jnp.float32)   # (8, TILE_N)
    prob_ref[...] = jax.nn.sigmoid(v).astype(prob_ref.dtype)

    v0 = v[0:1, :]                                       # (1, TILE_N)
    sp_neg = _softplus(-v0)    # -log(sigmoid(v))       -> pos-branch loss terms
    sp_pos = _softplus(v0)     # -log(1 - sigmoid(v))   -> neg-branch loss terms
    if mask_lanes:             # exclude padded node lanes from the sums
        lane = jax.lax.broadcasted_iota(jnp.int32, (1, tile_n), 1)
        remaining = n_valid - pl.program_id(0) * tile_n
        valid = lane < remaining
        sp_neg = jnp.where(valid, sp_neg, 0.0)
        sp_pos = jnp.where(valid, sp_pos, 0.0)

    lpos = jnp.sum(sp_neg, axis=1, keepdims=True)        # (1, 1)
    lneg = jnp.sum(sp_pos, axis=1, keepdims=True)
    lpos_ref[...] = jnp.broadcast_to(lpos[None, :, :], lpos_ref.shape)
    lneg_ref[...] = jnp.broadcast_to(lneg[None, :, :], lneg_ref.shape)


# -----------------------------------------------------------------------------
# Wrappers
# -----------------------------------------------------------------------------
@functools.partial(jax.jit, static_argnames=("tile_n",))
def dgi_encode_padded(x, w_enc, b_enc, *, tile_n=2048):
    """relu(x @ W + b) -> (pos_full bf16 padded to (n_pad, hp), summary (h,))."""
    n, f = x.shape
    h = w_enc.shape[1]
    fp, hp = _round_up(f, _LANE), _round_up(h, _LANE)
    tn, n_pad, g = _node_tiles(n, tile_n)

    x_p = _pad2d(x, n_pad, fp)                       # stays f32; cast in-kernel
    w_p = _pad2d(w_enc, fp, hp, jnp.bfloat16)        # resident bf16 weight
    b_p = _pad2d(b_enc.reshape(1, h), 1, hp, jnp.float32)

    # TODO(synk): for very large F/H (resident bf16 W > ~1/3 of v7x's 64 MiB
    # VMEM), add a K-axis grid with an f32 VMEM accumulator instead.
    kernel = functools.partial(_dgi_encode_kernel, n_valid=n, tile_n=tn,
                               mask_rows=(n_pad != n))

    pos_full, partials = pl.pallas_call(
        kernel,
        out_shape=(
            jax.ShapeDtypeStruct((n_pad, hp), jnp.bfloat16),
            jax.ShapeDtypeStruct((g, 8, hp), jnp.float32),
        ),
        grid=(g,),
        in_specs=[
            pl.BlockSpec((tn, fp), lambda i: (i, 0)),    # x node tile (f32)
            pl.BlockSpec((fp, hp), lambda i: (0, 0)),    # W_enc (resident bf16)
            pl.BlockSpec((1, hp), lambda i: (0, 0)),     # bias (resident f32)
        ],
        out_specs=(
            pl.BlockSpec((tn, hp), lambda i: (i, 0)),        # pos_z tile (bf16)
            pl.BlockSpec((1, 8, hp), lambda i: (i, 0, 0)),   # per-tile partial
        ),
        compiler_params=pltpu.CompilerParams(
            dimension_semantics=("parallel",),               # megacore on v7x
            vmem_limit_bytes=_VMEM_LIMIT_BYTES),
    )(x_p, w_p, b_p)

    summary = jax.nn.sigmoid(partials[:, 0, :h].sum(axis=0) / n)
    return pos_full, summary


def dgi_forward(x, w_enc, b_enc, perm, *, tile_n=2048):
    """Mirrors DeepGraphInfomax.forward -> (pos_z, neg_z, summary).
    Also returns the padded bf16 pos_full so the loss path can consume it
    directly without a slice-then-repad round trip."""
    n = x.shape[0]
    h = w_enc.shape[1]
    pos_full, summary = dgi_encode_padded(x, w_enc, b_enc, tile_n=tile_n)
    pos_z = pos_full[:n, :h]
    # Row-wise encoder + permutation corruption:
    #   encoder(corruption(x)) == encoder(x)[perm]  (exact) -> cheap row gather.
    # TODO(synk): a true message-passing encoder needs its own encode pass here.
    neg_z = jnp.take(pos_z, perm, axis=0)
    return pos_z, neg_z, summary, pos_full


@functools.partial(jax.jit, static_argnames=("n_valid", "h_valid", "tile_n"))
def dgi_discriminate_loss(pos_full, perm, weight, summary, *, n_valid, h_valid,
                          tile_n=2048):
    """Fused discriminate + loss on the PADDED bf16 latent.

    Only the positive branch hits the MXU: with the permutation corruption and
    this row-wise discriminator, neg_p == pos_p[perm] exactly and the neg-loss
    mean is permutation invariant.
    TODO(synk): keep a two-branch kernel for non-row-wise encoders.
    Returns (pos_p, neg_p, loss)."""
    n_pad, hp = pos_full.shape
    tn, n_pad2, g = _node_tiles(n_valid, tile_n)
    assert n_pad2 == n_pad, "pos_full padding must match the encode tiling"

    ws = (weight @ summary).reshape(1, h_valid)          # hoisted HxH matvec
    ws8 = jnp.broadcast_to(_pad2d(ws, 1, hp, jnp.bfloat16), (8, hp))

    kernel = functools.partial(_dgi_discriminate_loss_kernel, n_valid=n_valid,
                               tile_n=tn, mask_lanes=(n_pad != n_valid))

    prob, lpos, lneg = pl.pallas_call(
        kernel,
        out_shape=(
            jax.ShapeDtypeStruct((8, n_pad), jnp.float32),
            jax.ShapeDtypeStruct((g, 8, _LANE), jnp.float32),
            jax.ShapeDtypeStruct((g, 8, _LANE), jnp.float32),
        ),
        grid=(g,),
        in_specs=[
            pl.BlockSpec((tn, hp), lambda i: (i, 0)),    # pos_z tile (bf16)
            pl.BlockSpec((8, hp), lambda i: (0, 0)),     # ws (resident)
        ],
        out_specs=(
            pl.BlockSpec((8, tn), lambda i: (0, i)),         # node dim -> lanes
            pl.BlockSpec((1, 8, _LANE), lambda i: (i, 0, 0)),
            pl.BlockSpec((1, 8, _LANE), lambda i: (i, 0, 0)),
        ),
        compiler_params=pltpu.CompilerParams(
            dimension_semantics=("parallel",),
            vmem_limit_bytes=_VMEM_LIMIT_BYTES),
    )(pos_full, ws8)

    pos_p = prob[0, :n_valid]
    neg_p = jnp.take(pos_p, perm, axis=0)                # == sigmoid(neg_z @ ws)
    loss = (lpos[:, 0, 0].sum() + lneg[:, 0, 0].sum()) / n_valid
    return pos_p, neg_p, loss


# -----------------------------------------------------------------------------
# Main
# -----------------------------------------------------------------------------
if __name__ == "__main__":
    key = jax.random.PRNGKey(0)
    k_x, k_w, k_b, k_wdgi, k_perm = jax.random.split(key, 5)

    N = 2048          # number of nodes (tile clamps to 1024 -> grid of 2)
    F = 128           # input feature dim (lane-aligned)
    H = 128           # hidden_channels   (lane-aligned)

    x = jax.random.normal(k_x, (N, F), dtype=jnp.float32)
    w_enc = jax.random.normal(k_w, (F, H), dtype=jnp.float32) / jnp.sqrt(jnp.float32(F))
    b_enc = jax.random.normal(k_b, (H,), dtype=jnp.float32) * 0.01

    bound = 1.0 / jnp.sqrt(jnp.float32(H))
    weight = jax.random.uniform(k_wdgi, (H, H), dtype=jnp.float32,
                                minval=-bound, maxval=bound)

    # Corruption: node-row permutation.
    perm = jax.random.permutation(k_perm, N)

    # Forward pass (pos_z/neg_z/summary mirror the module; pos_full stays
    # padded + bf16 for the loss path).
    pos_z, neg_z, summary, pos_full = dgi_forward(x, w_enc, b_enc, perm)
    jax.block_until_ready((pos_z, neg_z, summary))

    # Fused discriminator (single branch) + loss, consuming the padded latent.
    pos_p, neg_p, loss = dgi_discriminate_loss(
        pos_full, perm, weight, summary, n_valid=N, h_valid=H)
    jax.block_until_ready((pos_p, neg_p, loss))

    # Plain-JAX f32 reference (tolerances absorb bf16 MXU inputs / bf16 pos_z).
    x_cor = x[perm]
    ref_pos = jnp.maximum(x @ w_enc + b_enc, 0.0)
    ref_neg = jnp.maximum(x_cor @ w_enc + b_enc, 0.0)
    ref_sum = jax.nn.sigmoid(ref_pos.mean(axis=0))
    assert jnp.allclose(pos_z.astype(jnp.float32), ref_pos, atol=2e-2, rtol=2e-2)
    assert jnp.allclose(neg_z.astype(jnp.float32), ref_neg, atol=2e-2, rtol=2e-2)
    assert jnp.allclose(summary, ref_sum, atol=2e-2)

    ref_ws = weight @ ref_sum
    ref_pos_p = jax.nn.sigmoid(ref_pos @ ref_ws)
    ref_neg_p = jax.nn.sigmoid(ref_neg @ ref_ws)
    ref_loss = (-jnp.log(ref_pos_p + EPS)).mean() + (-jnp.log(1.0 - ref_neg_p + EPS)).mean()
    assert jnp.allclose(pos_p, ref_pos_p, atol=5e-2)
    assert jnp.allclose(neg_p, ref_neg_p, atol=5e-2)
    assert jnp.allclose(loss, ref_loss, atol=5e-2)

    print("KERNEL_OK")
</pallas_src>

<mosaic_0001>
module attributes {stable_mosaic.version = 11 : i64} {
  func.func @_dgi_encode_kernel(%arg0: i32, %arg1: memref<1024x128xf32, #tpu.memory_space<vmem>>, %arg2: memref<128x128xbf16, #tpu.memory_space<vmem>>, %arg3: memref<1x128xf32, #tpu.memory_space<vmem>>, %arg4: memref<1024x128xbf16, #tpu.memory_space<vmem>>, %arg5: memref<1x8x128xf32, #tpu.memory_space<vmem>>) attributes {dimension_semantics = [#tpu.dimension_semantics<parallel>], iteration_bounds = array<i64: 2>, scalar_prefetch = 0 : i64, scratch_operands = 0 : i64, tpu.core_type = #tpu.core_type<tc>, window_params = [{transform_indices = @transform_0, window_bounds = array<i64: 1024, 128>}, {pipeline_mode = #tpu.pipeline_mode<synchronous>, transform_indices = @transform_1, window_bounds = array<i64: 128, 128>}, {pipeline_mode = #tpu.pipeline_mode<synchronous>, transform_indices = @transform_2, window_bounds = array<i64: 1, 128>}, {transform_indices = @transform_3, window_bounds = array<i64: 1024, 128>}, {transform_indices = @transform_4, window_bounds = array<i64: 1, 8, 128>}]} {
    %c0 = arith.constant 0 : index
    %c0_0 = arith.constant 0 : index
    %0 = vector.load %arg1[%c0, %c0_0] : memref<1024x128xf32, #tpu.memory_space<vmem>>, vector<1024x128xf32>
    %1 = arith.truncf %0 : vector<1024x128xf32> to vector<1024x128xbf16>
    %c0_1 = arith.constant 0 : index
    %c0_2 = arith.constant 0 : index
    %2 = vector.load %arg2[%c0_1, %c0_2] : memref<128x128xbf16, #tpu.memory_space<vmem>>, vector<128x128xbf16>
    %cst = arith.constant dense<0.000000e+00> : vector<1024x128xf32>
    %3 = tpu.matmul %1, %2, %cst {dimension_numbers = #tpu.dot_dimension_numbers<[1], [0], [0], [1], [0, 0, 1, 1], [], []>} : vector<1024x128xbf16>, vector<128x128xbf16>, vector<1024x128xf32> -> vector<1024x128xf32>
    %c0_3 = arith.constant 0 : index
    %c0_4 = arith.constant 0 : index
    %4 = vector.load %arg3[%c0_3, %c0_4] : memref<1x128xf32, #tpu.memory_space<vmem>>, vector<1x128xf32>
    %5 = vector.broadcast %4 : vector<1x128xf32> to vector<1024x128xf32>
    %6 = arith.addf %3, %5 : vector<1024x128xf32>
    %cst_5 = arith.constant 0.000000e+00 : f32
    %7 = vector.broadcast %cst_5 : f32 to vector<1024x128xf32>
    %8 = arith.maximumf %6, %7 : vector<1024x128xf32>
    %9 = arith.truncf %8 : vector<1024x128xf32> to vector<1024x128xbf16>
    %c0_6 = arith.constant 0 : index
    %c0_7 = arith.constant 0 : index
    %10 = vector.load %arg4[%c0_6, %c0_7] : memref<1024x128xbf16, #tpu.memory_space<vmem>>, vector<1024x128xbf16>
    tpu.vector_store %arg4[%c0_6, %c0_7], %9 {strides = array<i32>} : memref<1024x128xbf16, #tpu.memory_space<vmem>>, vector<1024x128xbf16>,
    %cst_8 = arith.constant dense<0.000000e+00> : vector<128xf32>
    %11 = vector.multi_reduction <add>, %8, %cst_8 [0] : vector<1024x128xf32> to vector<128xf32>
    %12 = vector.shape_cast %11 : vector<128xf32> to vector<1x128xf32>
    %13 = vector.shape_cast %12 : vector<1x128xf32> to vector<1x1x128xf32>
    %14 = vector.shape_cast %13 : vector<1x1x128xf32> to vector<1x1x128xf32>
    %15 = vector.broadcast %14 : vector<1x1x128xf32> to vector<1x8x128xf32>
    %c0_9 = arith.constant 0 : index
    %c0_10 = arith.constant 0 : index
    %c0_11 = arith.constant 0 : index
    %16 = vector.load %arg5[%c0_9, %c0_10, %c0_11] : memref<1x8x128xf32, #tpu.memory_space<vmem>>, vector<1x8x128xf32>
    tpu.vector_store %arg5[%c0_9, %c0_10, %c0_11], %15 {strides = array<i32>} : memref<1x8x128xf32, #tpu.memory_space<vmem>>, vector<1x8x128xf32>,
    return
  }
  func.func @transform_0(%arg0: i32) -> (i32, i32) {
    %c0_i32 = arith.constant 0 : i32
    %c0_i32_0 = arith.constant 0 : i32
    return %arg0, %c0_i32 : i32, i32
  }
  func.func @transform_1(%arg0: i32) -> (i32, i32) {
    %c0_i32 = arith.constant 0 : i32
    %c0_i32_0 = arith.constant 0 : i32
    %c0_i32_1 = arith.constant 0 : i32
    return %c0_i32, %c0_i32_0 : i32, i32
  }
  func.func @transform_2(%arg0: i32) -> (i32, i32) {
    %c0_i32 = arith.constant 0 : i32
    %c0_i32_0 = arith.constant 0 : i32
    %c0_i32_1 = arith.constant 0 : i32
    return %c0_i32, %c0_i32_0 : i32, i32
  }
  func.func @transform_3(%arg0: i32) -> (i32, i32) {
    %c0_i32 = arith.constant 0 : i32
    %c0_i32_0 = arith.constant 0 : i32
    return %arg0, %c0_i32 : i32, i32
  }
  func.func @transform_4(%arg0: i32) -> (i32, i32, i32) {
    %c0_i32 = arith.constant 0 : i32
    %c0_i32_0 = arith.constant 0 : i32
    %c0_i32_1 = arith.constant 0 : i32
    return %arg0, %c0_i32, %c0_i32_0 : i32, i32, i32
  }
}

</mosaic_0001>

<bundles_post_ra>
// kernel: dgi_encode_padded.1
= control target key start
LH: loop header
LB: loop body
LE: loop exit
PB: predicated region body
PF: predicated region fallthrough
CT: control target
= control target key end

     0   :  { %10 = vsyncpa [#allocation3], 0  ;;  %s4103_s0 = inlined_call_operand.hbm [shape: f32[2048,128], index: 0, kind: input, shape index: {}]   ;;  %s4104_s1 = inlined_call_operand.vmem [shape: bf16[128,128], index: 1, kind: input, shape index: {}]   ;;  %s4105_s2 = inlined_call_operand.vmem [shape: f32[1,128], index: 2, kind: input, shape index: {}]   ;;  %s4106_s3 = inlined_call_operand.hbm [shape: bf16[2048,128], index: 3, kind: output, shape index: {0}]   ;;  %s4107_s4 = inlined_call_operand.vmem [shape: f32[2,8,128], index: 4, kind: output, shape index: {1}]  }
   0x1   :  { %12 = vsyncpa [#allocation3 + $0x1], 0 }
   0x2   :  { %13 = vsyncpa [#allocation4], 0 }
   0x3   :  { %15 = vsyncpa [#allocation4 + $0x1], 0  ;;  %s3143_s15 = smov 0   ;;  %s3145_s16 = smov 0  }
   0x4   :  { %s3147_s17 = smov 0   ;;  %s3149_s18 = smov 0  }
   0x5 LB: > { %s3164_s19 = sadd.s32 4294967295, %s3110_s18   ;;  %s2058_s20 = sadd.s32 4294967294, %s3110_s18   ;;  %s3110_s18 = sphi %s3149_s18, %s4300_s18   ;;  %s3106_s17 = sphi %s3147_s17, %s4299_s17   ;;  %s3102_s16 = sphi %s3145_s16, %s4298_s16   ;;  %s3098_s15 = sphi %s3143_s15, %s4297_s15  }
   0x6   : > { %s3168_s21 = sadd.s32 1, %s3110_s18   ;;  %s28_s22 = sadd.s32 1, %s3106_s17 }
   0x7   : > { %s25_s23 = ssub.s32 %s3110_s18, %s3168_s21  ;;  %p35_p0 = scmp.ne.s32.totalorder %s3106_s17, %s3102_s16 }
   0x8   : > { %p26_p1 = scmp.eq.s32.totalorder %s25_s23, 0  ;;  %p36_p2 = scmp.eq.s32.totalorder %s3110_s18, 0 }
   0x9   : > { %p41_p3 = scmp.ne.s32.totalorder %s3102_s16, %s3098_s15  ;;  %p42_p4 = scmp.eq.s32.totalorder %s3164_s19, 0 }
   0xa   : > { %s3180_s24 = scalar_select %p26_p1, %s3106_s17, %s28_s22  }
   0xb   : > { %p3182_p5 = por %p36_p2, %p35_p0  ;;  %p3186_p6 = por %p42_p4, %p41_p3 }
   0xc   : > { %p107_p7 = scmp.eq.s32.totalorder %s3164_s19, 1  ;;  %p113_p8 = scmp.eq.s32.totalorder %s2058_s20, 1 }
   0xd   : > { %p2967_p10 = scmp.lt.s32.totalorder %s3110_s18, 2  ;;  %s165_s29 = sand.u32 1, %s3106_s17  }
   0xe   : > { %p3193_p11 = por %p107_p7, %p35_p0  ;;  %p3197_p12 = por %p113_p8, %p41_p3 }
   0xf   : > { %s2210_s30 = sshll.u32 %s3110_s18, 14  ;;  %s2061_s5 = sshll.u32 %s165_s29, 10 }
  0x10   : > { %s4184_s27 = scalar_select %p3193_p11, 1, 0 }
  0x11   : > { %s4185_s28 = scalar_select %p3197_p12, 1, 0 }
  0x12   : > { %s3206_s8 = scalar_lea.hbm %s4103_s0, %s2210_s30  ;;  %s169_s9 = scalar_lea.vmem [#allocation2], %s2061_s5 }
  0x13   : > { %s176_s10 = sshll.u32 %s169_s9, 4  ;;  %p3210_p13 = pnand %p2967_p10, %p3182_p5  ;;  %s3214_s10 = int_to_ptr.vmem [resolvable:$true] %s176_s10 }
  0x14   : > { %s3216_s12 = scalar_lea.sflag [#allocation3], %s165_s29  ;;  %s3014_s13 = scalar_lea.hbm %s3206_s8, 16384 }
  0x15   : > { %p3015_p0 = scmp.ne.s32.totalorder %s3206_s8, %s3014_s13  ;;  %p3016_p1 = pneg %p3210_p13 }
  0x16   : > { %s3019_s22 = scalar_lea.hbm %s4103_s0, 32768  ;;  %p3020_p4 = scmp.lt.u32.totalorder %s3206_s8, %s4103_s0 }
  0x17   : > { %p3017_p2 = pnand %p3016_p1, %p3015_p0  ;;  %p3021_p5 = scmp.lt.u32.totalorder %s3019_s22, %s3014_s13 }
  0x18   : > { %p3023_p8 = scmp.lt.u32.totalorder %s3014_s13, %s3206_s8 }
  0x19   : > { %p3018_p3 = pneg %p3017_p2  ;;  %p3022_p7 = por %p3021_p5, %p3020_p4 }
  0x1b   : > { %p3024_p10 = por %p3023_p8, %p3022_p7 }
  0x1d   : > { %p3025_p9 = pnand %p3024_p10, %p3018_p3 }
  0x1f   : > { %3028 = shalt.err (!%p3025_p9)
}
  0x20   : > { %s3029_s29 = scalar_lea.vmem %s3214_s10, 16384  ;;  %s3112_s30 = smov [#allocation2]  }
  0x21   : > { %p3030_p0 = scmp.ne.s32.totalorder %s3214_s10, %s3029_s29  ;;  %s3034_s5 = sshll.u32 %s3112_s30, 4  ;;  %s3035_s5 = int_to_ptr.vmem [resolvable:$false] %s3034_s5 }
  0x22   : > { %s3036_s6 = scalar_lea.vmem %s3035_s5, 32768  ;;  %p3037_p11 = scmp.lt.s32.totalorder %s3214_s10, %s3035_s5 }
  0x23   : > { %p3032_p2 = pnand %p3030_p0, %p3016_p1  ;;  %p3038_p4 = scmp.lt.s32.totalorder %s3036_s6, %s3029_s29 }
  0x25   : > { %p3033_p12 = pneg %p3032_p2  ;;  %p3039_p5 = por %p3038_p4, %p3037_p11 }
  0x27   : > { %p3040_p7 = pnand %p3039_p5, %p3033_p12 }
  0x29   : > { %3043 = shalt.err (!%p3040_p7)
}
  0x2a   : > { %s3113_s7 = smov 128   ;;  %s3114_s9 = smov 8  }
  0x2b   : > { %2962 = dma.hbm_to_vmem [thread:$0]  (!%p3210_p13), %s3206_s8, 16384, %s3214_s10, %s3216_s12, %s3113_s7, %s3113_s7, %s3114_s9  }
  0x2c   : > { %p2064_p9 = scmp.ge.s32.totalorder %s3110_s18, 1  ;;  %p184_p1 = scmp.lt.s32.totalorder %s3110_s18, 3 }
  0x2e   : > { %p185_p3 = pnand %p2064_p9, %p184_p1 }
  0x30   : > { %188 = sbr.rel (%p185_p3) target bundleno = 591 (0x24f), region = 32 }
  0x37   : > { %s3247_s13 = sand.u32 1, %s3102_s16  }
  0x38   : > { %s2065_s14 = sshll.u32 %s3247_s13, 10  ;;  %s191_s20 = scalar_lea.sflag [#allocation3], %s3247_s13 }
  0x39   : > { %s3251_s22 = scalar_lea.vmem [#allocation2], %s2065_s14 }
  0x3a   : > { %3089 = dma.done.wait (%p3186_p6), %s191_s20, 16384  }
  0x3b   : > { %3091 = vsyncadd (%p3186_p6), %s191_s20, 4294950912  ;;  %v3005_v0 = vld [vmem:[%s4104_s1] sm:$0xff]   ;;  %v3006_v1 = vld [vmem:[%s4104_s1 + $0x8] sm:$0xff]   ;;  %s2339_s26 = sshll.u32 %s3164_s19, 13  ;;  %s1941_s7 = scalar_lea.sflag [#allocation4], %s3247_s13 }
  0x3c   : > { %2795 = vmatprep.subr.bf16.mxu0 %v3005_v0  ;;  %2939 = vmatprep.subr.bf16.mxu1 %v3005_v0  ;;  %v3007_v2 = vld [vmem:[%s4104_s1 + $0x10] sm:$0xff]   ;;  %v3008_v3 = vld [vmem:[%s4104_s1 + $0x18] sm:$0xff]   ;;  %v230_v4 = vld [vmem:[%s3251_s22] sm:$0xff]  ;;  %s3936_s6 = scalar_lea.hbm %s4106_s3, %s2339_s26  ;;  %p4222_p11 = scmp.ne.s32.totalorder %s4184_s27, 0 }
  0x3d   : > { %2796 = vmatpush3.bf16.msra.mxu0 %v3005_v0  ;;  %2947 = vmatpush3.bf16.msra.mxu1 %v3005_v0  ;;  %v231_v5 = vld [vmem:[%s3251_s22 + $0x8] sm:$0xff]  ;;  %v3009_v7 = vld [vmem:[%s4104_s1 + $0x20] sm:$0xff]   ;;  %v3011_v9 = vld [vmem:[%s4104_s1 + $0x30] sm:$0xff]   ;;  %s3115_s14 = smov [#allocation5]  }
  0x3e   : > { %2797 = vmatprep.subr.bf16.mxu0 %v3006_v1  ;;  %2940 = vmatprep.subr.bf16.mxu1 %v3006_v1  ;;  %v358_v6 = vpack.c.bf16 %v231_v5, %v230_v4  ;;  %v3010_v8 = vld [vmem:[%s4104_s1 + $0x28] sm:$0xff]   ;;  %v3012_v10 = vld [vmem:[%s4104_s1 + $0x38] sm:$0xff]   ;;  %v232_v11 = vld [vmem:[%s3251_s22 + $0x10] sm:$0xff]  ;;  %s3048_s20 = sshll.u32 %s3115_s14, 4  ;;  %s3049_s20 = int_to_ptr.vmem [resolvable:$false] %s3048_s20 }
  0x3f   : > { %v233_v12 = vld [vmem:[%s3251_s22 + $0x18] sm:$0xff]  ;;  %v234_v13 = vld [vmem:[%s3251_s22 + $0x20] sm:$0xff]  ;;  %v235_v14 = vld [vmem:[%s3251_s22 + $0x28] sm:$0xff]  ;;  %s3050_s8 = scalar_lea.vmem %s3049_s20, 16384 }
  0x40   : > { %2811 = vmatprep.mubr.bf16.mxu0 %v358_v6  ;;  %v294_v15 = vld [vmem:[%s3251_s22 + $0x200] sm:$0xff]  ;;  %v295_v16 = vld [vmem:[%s3251_s22 + $0x208] sm:$0xff]  ;;  %v359_v17 = vpack.c.bf16 %v233_v12, %v232_v11  ;;  %v296_v19 = vld [vmem:[%s3251_s22 + $0x210] sm:$0xff]  ;;  %v360_v22 = vpack.c.bf16 %v235_v14, %v234_v13 }
  0x41   : > { %2798 = vmatpush3.bf16.msra.mxu0 %v3006_v1  ;;  %2948 = vmatpush3.bf16.msra.mxu1 %v3006_v1  ;;  %v390_v18 = vpack.c.bf16 %v295_v16, %v294_v15  ;;  %v297_v20 = vld [vmem:[%s3251_s22 + $0x218] sm:$0xff]  ;;  %v298_v21 = vld [vmem:[%s3251_s22 + $0x220] sm:$0xff]  ;;  %v299_v24 = vld [vmem:[%s3251_s22 + $0x228] sm:$0xff] }
  0x42   : > { %2799 = vmatprep.subr.bf16.mxu0 %v3007_v2  ;;  %2941 = vmatprep.subr.bf16.mxu1 %v3007_v2  ;;  %v391_v23 = vpack.c.bf16 %v297_v20, %v296_v19  ;;  %v392_v25 = vpack.c.bf16 %v299_v24, %v298_v21  ;;  %v236_v26 = vld [vmem:[%s3251_s22 + $0x30] sm:$0xff]  ;;  %v237_v27 = vld [vmem:[%s3251_s22 + $0x38] sm:$0xff]  ;;  %v238_v28 = vld [vmem:[%s3251_s22 + $0x40] sm:$0xff] }
  0x43   : > { %2875 = vmatprep.mubr.bf16.mxu1 %v390_v18  ;;  %v239_v29 = vld [vmem:[%s3251_s22 + $0x48] sm:$0xff]  ;;  %v300_v30 = vld [vmem:[%s3251_s22 + $0x230] sm:$0xff]  ;;  %v301_v31 = vld [vmem:[%s3251_s22 + $0x238] sm:$0xff]  ;;  %v361_v34 = vpack.c.bf16 %v237_v27, %v236_v26 }
  0x44   : > { %v302_v32 = vld [vmem:[%s3251_s22 + $0x240] sm:$0xff]  ;;  %v303_v33 = vld [vmem:[%s3251_s22 + $0x248] sm:$0xff]  ;;  %v362_v35 = vpack.c.bf16 %v239_v29, %v238_v28  ;;  %v393_v36 = vpack.c.bf16 %v301_v31, %v300_v30  ;;  %v240_v38 = vld [vmem:[%s3251_s22 + $0x50] sm:$0xff] }
  0x45   : > { %2800 = vmatpush3.bf16.msra.mxu0 %v3007_v2  ;;  %2949 = vmatpush3.bf16.msra.mxu1 %v3007_v2  ;;  %v394_v37 = vpack.c.bf16 %v303_v33, %v302_v32  ;;  %v241_v39 = vld [vmem:[%s3251_s22 + $0x58] sm:$0xff]  ;;  %v242_v40 = vld [vmem:[%s3251_s22 + $0x60] sm:$0xff]  ;;  %v243_v41 = vld [vmem:[%s3251_s22 + $0x68] sm:$0xff] }
  0x46   : > { %2801 = vmatprep.subr.bf16.mxu0 %v3008_v3  ;;  %2942 = vmatprep.subr.bf16.mxu1 %v3008_v3  ;;  %v304_v42 = vld [vmem:[%s3251_s22 + $0x250] sm:$0xff]  ;;  %v305_v43 = vld [vmem:[%s3251_s22 + $0x258] sm:$0xff]  ;;  %v306_v44 = vld [vmem:[%s3251_s22 + $0x260] sm:$0xff]  ;;  %v363_v46 = vpack.c.bf16 %v241_v39, %v240_v38  ;;  %v364_v47 = vpack.c.bf16 %v243_v41, %v242_v40 }
  0x47   : > { %v307_v45 = vld [vmem:[%s3251_s22 + $0x268] sm:$0xff]  ;;  %v395_v48 = vpack.c.bf16 %v305_v43, %v304_v42  ;;  %v244_v50 = vld [vmem:[%s3251_s22 + $0x70] sm:$0xff]  ;;  %v245_v51 = vld [vmem:[%s3251_s22 + $0x78] sm:$0xff] }
  0x48   : > { %v396_v49 = vpack.c.bf16 %v307_v45, %v306_v44  ;;  %v246_v52 = vld [vmem:[%s3251_s22 + $0x80] sm:$0xff]  ;;  %v247_v53 = vld [vmem:[%s3251_s22 + $0x88] sm:$0xff]  ;;  %v308_v54 = vld [vmem:[%s3251_s22 + $0x270] sm:$0xff]  ;;  %v365_v58 = vpack.c.bf16 %v245_v51, %v244_v50 }
  0x49   : > { %2802 = vmatpush3.bf16.msra.mxu0 %v3008_v3  ;;  %2950 = vmatpush3.bf16.msra.mxu1 %v3008_v3  ;;  %v309_v55 = vld [vmem:[%s3251_s22 + $0x278] sm:$0xff]  ;;  %v310_v56 = vld [vmem:[%s3251_s22 + $0x280] sm:$0xff]  ;;  %v311_v57 = vld [vmem:[%s3251_s22 + $0x288] sm:$0xff]  ;;  %v366_v59 = vpack.c.bf16 %v247_v53, %v246_v52 }
  0x4a   : > { %2803 = vmatprep.subr.bf16.mxu0 %v3009_v7  ;;  %2943 = vmatprep.subr.bf16.mxu1 %v3009_v7  ;;  %v397_v60 = vpack.c.bf16 %v309_v55, %v308_v54  ;;  %v398_v61 = vpack.c.bf16 %v311_v57, %v310_v56  ;;  %v248_v62 = vld [vmem:[%s3251_s22 + $0x90] sm:$0xff]  ;;  %v249_v63 = vld [vmem:[%s3251_s22 + $0x98] sm:$0xff]  ;;  %v250_v0 = vld [vmem:[%s3251_s22 + $0xa0] sm:$0xff] }
  0x4b   : > { %v251_v1 = vld [vmem:[%s3251_s22 + $0xa8] sm:$0xff]  ;;  %v312_v2 = vld [vmem:[%s3251_s22 + $0x290] sm:$0xff]  ;;  %v313_v3 = vld [vmem:[%s3251_s22 + $0x298] sm:$0xff]  ;;  %v367_v6 = vpack.c.bf16 %v249_v63, %v248_v62 }
  0x4c   : > { %v314_v4 = vld [vmem:[%s3251_s22 + $0x2a0] sm:$0xff]  ;;  %v315_v5 = vld [vmem:[%s3251_s22 + $0x2a8] sm:$0xff]  ;;  %v253_v11 = vld [vmem:[%s3251_s22 + $0xb8] sm:$0xff] }
  0x4d   : > { %2804 = vmatpush3.bf16.msra.mxu0 %v3009_v7  ;;  %2951 = vmatpush3.bf16.msra.mxu1 %v3009_v7  ;;  %v368_v7 = vpack.c.bf16 %v251_v1, %v250_v0  ;;  %v254_v12 = vld [vmem:[%s3251_s22 + $0xc0] sm:$0xff]  ;;  %v255_v13 = vld [vmem:[%s3251_s22 + $0xc8] sm:$0xff]  ;;  %v316_v14 = vld [vmem:[%s3251_s22 + $0x2b0] sm:$0xff] }
  0x4e   : > { %2805 = vmatprep.subr.bf16.mxu0 %v3010_v8  ;;  %2944 = vmatprep.subr.bf16.mxu1 %v3010_v8  ;;  %v317_v15 = vld [vmem:[%s3251_s22 + $0x2b8] sm:$0xff]  ;;  %v318_v16 = vld [vmem:[%s3251_s22 + $0x2c0] sm:$0xff]  ;;  %v370_v19 = vpack.c.bf16 %v255_v13, %v254_v12  ;;  %v320_v26 = vld [vmem:[%s3251_s22 + $0x2d0] sm:$0xff] }
  0x4f   : > { %v401_v20 = vpack.c.bf16 %v317_v15, %v316_v14  ;;  %v258_v24 = vld [vmem:[%s3251_s22 + $0xe0] sm:$0xff]  ;;  %v321_v27 = vld [vmem:[%s3251_s22 + $0x2d8] sm:$0xff]  ;;  %v323_v29 = vld [vmem:[%s3251_s22 + $0x2e8] sm:$0xff] }
  0x50   : > { %v322_v28 = vld [vmem:[%s3251_s22 + $0x2e0] sm:$0xff]  ;;  %v403_v32 = vpack.c.bf16 %v321_v27, %v320_v26  ;;  %v324_v38 = vld [vmem:[%s3251_s22 + $0x2f0] sm:$0xff]  ;;  %v325_v39 = vld [vmem:[%s3251_s22 + $0x2f8] sm:$0xff] }
  0x51   : > { %2806 = vmatpush3.bf16.msra.mxu0 %v3010_v8  ;;  %2952 = vmatpush3.bf16.msra.mxu1 %v3010_v8  ;;  %v399_v8 = vpack.c.bf16 %v313_v3, %v312_v2  ;;  %v404_v33 = vpack.c.bf16 %v323_v29, %v322_v28  ;;  %v326_v40 = vld [vmem:[%s3251_s22 + $0x300] sm:$0xff]  ;;  %v327_v41 = vld [vmem:[%s3251_s22 + $0x308] sm:$0xff]  ;;  %v405_v44 = vpack.c.bf16 %v325_v39, %v324_v38  ;;  %v328_v50 = vld [vmem:[%s3251_s22 + $0x310] sm:$0xff] }
  0x52   : > { %2807 = vmatprep.subr.bf16.mxu0 %v3011_v9  ;;  %2945 = vmatprep.subr.bf16.mxu1 %v3011_v9  ;;  %v406_v45 = vpack.c.bf16 %v327_v41, %v326_v40  ;;  %v329_v51 = vld [vmem:[%s3251_s22 + $0x318] sm:$0xff]  ;;  %v330_v52 = vld [vmem:[%s3251_s22 + $0x320] sm:$0xff]  ;;  %v331_v53 = vld [vmem:[%s3251_s22 + $0x328] sm:$0xff] }
  0x53   : > { %v407_v56 = vpack.c.bf16 %v329_v51, %v328_v50  ;;  %v408_v57 = vpack.c.bf16 %v331_v53, %v330_v52  ;;  %v332_v62 = vld [vmem:[%s3251_s22 + $0x330] sm:$0xff]  ;;  %v333_v63 = vld [vmem:[%s3251_s22 + $0x338] sm:$0xff]  ;;  %v334_v0 = vld [vmem:[%s3251_s22 + $0x340] sm:$0xff] }
  0x54   : > { %v335_v1 = vld [vmem:[%s3251_s22 + $0x348] sm:$0xff]  ;;  %v276_v15 = vld [vmem:[%s3251_s22 + $0x170] sm:$0xff]  ;;  %v281_v28 = vld [vmem:[%s3251_s22 + $0x198] sm:$0xff] }
  0x55   : > { %2808 = vmatpush3.bf16.msra.mxu0 %v3011_v9  ;;  %2953 = vmatpush3.bf16.msra.mxu1 %v3011_v9  ;;  %v400_v9 = vpack.c.bf16 %v315_v5, %v314_v4  ;;  %v409_v4 = vpack.c.bf16 %v333_v63, %v332_v62  ;;  %v410_v5 = vpack.c.bf16 %v335_v1, %v334_v0  ;;  %v280_v27 = vld [vmem:[%s3251_s22 + $0x190] sm:$0xff]  ;;  %v282_v29 = vld [vmem:[%s3251_s22 + $0x1a0] sm:$0xff]  ;;  %v285_v40 = vld [vmem:[%s3251_s22 + $0x1b8] sm:$0xff] }
  0x56   : > { %2809 = vmatprep.subr.bf16.mxu0 %v3012_v10  ;;  %2946 = vmatprep.subr.bf16.mxu1 %v3012_v10  ;;  %v284_v39 = vld [vmem:[%s3251_s22 + $0x1b0] sm:$0xff]  ;;  %v286_v41 = vld [vmem:[%s3251_s22 + $0x1c0] sm:$0xff]  ;;  %v289_v52 = vld [vmem:[%s3251_s22 + $0x1d8] sm:$0xff] }
  0x57   : > { %v288_v51 = vld [vmem:[%s3251_s22 + $0x1d0] sm:$0xff]  ;;  %v290_v53 = vld [vmem:[%s3251_s22 + $0x1e0] sm:$0xff]  ;;  %v293_v0 = vld [vmem:[%s3251_s22 + $0x1f8] sm:$0xff] }
  0x58   : > { %v292_v63 = vld [vmem:[%s3251_s22 + $0x1f0] sm:$0xff]  ;;  %v354_v1 = vld [vmem:[%s3251_s22 + $0x3e0] sm:$0xff] }
  0x59   : > { %2810 = vmatpush3.bf16.msra.mxu0 %v3012_v10  ;;  %2954 = vmatpush3.bf16.msra.mxu1 %v3012_v10  ;;  %v252_v10 = vld [vmem:[%s3251_s22 + $0xb0] sm:$0xff] }
  0x5a   : > { %v369_v18 = vpack.c.bf16 %v253_v11, %v252_v10  ;;  %v336_v10 = vld [vmem:[%s3251_s22 + $0x350] sm:$0xff]  ;;  %v337_v11 = vld [vmem:[%s3251_s22 + $0x358] sm:$0xff] }
  0x5b   : > { %v411_v14 = vpack.c.bf16 %v337_v11, %v336_v10 }
  0x5c   : > { %2812 = vmatmul.mubr.bf16.vlgmr.msra.gmra.mrb[0].mxu0 %v359_v17  ;;  %2876 = vmatmul.mubr.bf16.vlgmr.msra.gmra.mrb[0].mxu1 %v391_v23  ;;  %v319_v17 = vld [vmem:[%s3251_s22 + $0x2c8] sm:$0xff]  ;;  %v257_v23 = vld [vmem:[%s3251_s22 + $0xd8] sm:$0xff] }
  0x5d   : > { %2815 = vmatprep.mubr.bf16.mxu0 %v360_v22  ;;  %2879 = vmatprep.mubr.bf16.mxu1 %v392_v25  ;;  %v402_v21 = vpack.c.bf16 %v319_v17, %v318_v16  ;;  %v256_v22 = vld [vmem:[%s3251_s22 + $0xd0] sm:$0xff]  ;;  %v259_v25 = vld [vmem:[%s3251_s22 + $0xe8] sm:$0xff]  ;;  %v277_v16 = vld [vmem:[%s3251_s22 + $0x178] sm:$0xff] }
  0x5e   : > { %v371_v30 = vpack.c.bf16 %v257_v23, %v256_v22  ;;  %v372_v31 = vpack.c.bf16 %v259_v25, %v258_v24  ;;  %v278_v17 = vld [vmem:[%s3251_s22 + $0x180] sm:$0xff]  ;;  %v340_v22 = vld [vmem:[%s3251_s22 + $0x370] sm:$0xff]  ;;  %v341_v23 = vld [vmem:[%s3251_s22 + $0x378] sm:$0xff]  ;;  %v381_v24 = vpack.c.bf16 %v277_v16, %v276_v15 }
  0x5f   : > { %v413_v26 = vpack.c.bf16 %v341_v23, %v340_v22 }
  0x64   : > { %2816 = vmatmul.mubr.bf16.gmra.mrb[4].mxu0 %v361_v34  ;;  %2880 = vmatmul.mubr.bf16.gmra.mrb[4].mxu1 %v393_v36  ;;  %v260_v34 = vld [vmem:[%s3251_s22 + $0xf0] sm:$0xff]  ;;  %v262_v36 = vld [vmem:[%s3251_s22 + $0x100] sm:$0xff] }
  0x65   : > { %2819 = vmatprep.mubr.bf16.mxu0 %v362_v35  ;;  %2883 = vmatprep.mubr.bf16.mxu1 %v394_v37  ;;  %v261_v35 = vld [vmem:[%s3251_s22 + $0xf8] sm:$0xff]  ;;  %v263_v37 = vld [vmem:[%s3251_s22 + $0x108] sm:$0xff] }
  0x66   : > { %v373_v42 = vpack.c.bf16 %v261_v35, %v260_v34  ;;  %v374_v43 = vpack.c.bf16 %v263_v37, %v262_v36  ;;  %v344_v34 = vld [vmem:[%s3251_s22 + $0x390] sm:$0xff]  ;;  %v345_v35 = vld [vmem:[%s3251_s22 + $0x398] sm:$0xff]  ;;  %v383_v36 = vpack.c.bf16 %v281_v28, %v280_v27 }
  0x67   : > { %v415_v38 = vpack.c.bf16 %v345_v35, %v344_v34 }
  0x6c   : > { %2820 = vmatmul.mubr.bf16.gmra.mrb[8].mxu0 %v363_v46  ;;  %2884 = vmatmul.mubr.bf16.gmra.mrb[8].mxu1 %v395_v48  ;;  %v264_v46 = vld [vmem:[%s3251_s22 + $0x110] sm:$0xff]  ;;  %v266_v48 = vld [vmem:[%s3251_s22 + $0x120] sm:$0xff] }
  0x6d   : > { %2823 = vmatprep.mubr.bf16.mxu0 %v364_v47  ;;  %2887 = vmatprep.mubr.bf16.mxu1 %v396_v49  ;;  %v265_v47 = vld [vmem:[%s3251_s22 + $0x118] sm:$0xff]  ;;  %v267_v49 = vld [vmem:[%s3251_s22 + $0x128] sm:$0xff] }
  0x6e   : > { %v375_v54 = vpack.c.bf16 %v265_v47, %v264_v46  ;;  %v376_v55 = vpack.c.bf16 %v267_v49, %v266_v48  ;;  %v348_v46 = vld [vmem:[%s3251_s22 + $0x3b0] sm:$0xff]  ;;  %v349_v47 = vld [vmem:[%s3251_s22 + $0x3b8] sm:$0xff]  ;;  %v385_v48 = vpack.c.bf16 %v285_v40, %v284_v39 }
  0x6f   : > { %v417_v50 = vpack.c.bf16 %v349_v47, %v348_v46 }
  0x74   : > { %2824 = vmatmul.mubr.bf16.gmra.mrb[12].mxu0 %v365_v58  ;;  %2888 = vmatmul.mubr.bf16.gmra.mrb[12].mxu1 %v397_v60  ;;  %v268_v58 = vld [vmem:[%s3251_s22 + $0x130] sm:$0xff]  ;;  %v270_v60 = vld [vmem:[%s3251_s22 + $0x140] sm:$0xff] }
  0x75   : > { %2827 = vmatprep.mubr.bf16.mxu0 %v366_v59  ;;  %2891 = vmatprep.mubr.bf16.mxu1 %v398_v61  ;;  %v269_v59 = vld [vmem:[%s3251_s22 + $0x138] sm:$0xff]  ;;  %v271_v61 = vld [vmem:[%s3251_s22 + $0x148] sm:$0xff] }
  0x76   : > { %v377_v2 = vpack.c.bf16 %v269_v59, %v268_v58  ;;  %v378_v3 = vpack.c.bf16 %v271_v61, %v270_v60  ;;  %v352_v58 = vld [vmem:[%s3251_s22 + $0x3d0] sm:$0xff]  ;;  %v353_v59 = vld [vmem:[%s3251_s22 + $0x3d8] sm:$0xff]  ;;  %v387_v60 = vpack.c.bf16 %v289_v52, %v288_v51 }
  0x77   : > { %v419_v62 = vpack.c.bf16 %v353_v59, %v352_v58 }
  0x7c   : > { %2828 = vmatmul.mubr.bf16.gmra.mrb[16].mxu0 %v367_v6  ;;  %2892 = vmatmul.mubr.bf16.gmra.mrb[16].mxu1 %v399_v8  ;;  %v272_v6 = vld [vmem:[%s3251_s22 + $0x150] sm:$0xff]  ;;  %v274_v8 = vld [vmem:[%s3251_s22 + $0x160] sm:$0xff] }
  0x7d   : > { %2831 = vmatprep.mubr.bf16.mxu0 %v368_v7  ;;  %2895 = vmatprep.mubr.bf16.mxu1 %v400_v9  ;;  %v273_v7 = vld [vmem:[%s3251_s22 + $0x158] sm:$0xff]  ;;  %v275_v9 = vld [vmem:[%s3251_s22 + $0x168] sm:$0xff] }
  0x7e   : > { %v379_v12 = vpack.c.bf16 %v273_v7, %v272_v6  ;;  %v380_v13 = vpack.c.bf16 %v275_v9, %v274_v8  ;;  %v389_v6 = vpack.c.bf16 %v293_v0, %v292_v63  ;;  %v3412_v8 = vld [vmem:[%s4105_s2] ss:$0 sm:$0xff] }
  0x84   : > { %2832 = vmatmul.mubr.bf16.gmra.mrb[20].mxu0 %v369_v18  ;;  %2896 = vmatmul.mubr.bf16.gmra.mrb[20].mxu1 %v401_v20  ;;  %v338_v18 = vld [vmem:[%s3251_s22 + $0x360] sm:$0xff]  ;;  %v279_v20 = vld [vmem:[%s3251_s22 + $0x188] sm:$0xff] }
  0x85   : > { %2835 = vmatprep.mubr.bf16.mxu0 %v370_v19  ;;  %2899 = vmatprep.mubr.bf16.mxu1 %v402_v21  ;;  %v339_v19 = vld [vmem:[%s3251_s22 + $0x368] sm:$0xff]  ;;  %v382_v25 = vpack.c.bf16 %v279_v20, %v278_v17 }
  0x86   : > { %v412_v21 = vpack.c.bf16 %v339_v19, %v338_v18 }
  0x8c   : > { %2836 = vmatmul.mubr.bf16.gmra.mrb[24].mxu0 %v371_v30  ;;  %2900 = vmatmul.mubr.bf16.gmra.mrb[24].mxu1 %v403_v32  ;;  %v342_v30 = vld [vmem:[%s3251_s22 + $0x380] sm:$0xff]  ;;  %v283_v32 = vld [vmem:[%s3251_s22 + $0x1a8] sm:$0xff] }
  0x8d   : > { %2839 = vmatprep.mubr.bf16.mxu0 %v372_v31  ;;  %2903 = vmatprep.mubr.bf16.mxu1 %v404_v33  ;;  %v343_v31 = vld [vmem:[%s3251_s22 + $0x388] sm:$0xff]  ;;  %v384_v37 = vpack.c.bf16 %v283_v32, %v282_v29 }
  0x8e   : > { %v414_v33 = vpack.c.bf16 %v343_v31, %v342_v30 }
  0x94   : > { %2840 = vmatmul.mubr.bf16.gmra.mrb[28].mxu0 %v373_v42  ;;  %2904 = vmatmul.mubr.bf16.gmra.mrb[28].mxu1 %v405_v44  ;;  %v346_v42 = vld [vmem:[%s3251_s22 + $0x3a0] sm:$0xff]  ;;  %v287_v44 = vld [vmem:[%s3251_s22 + $0x1c8] sm:$0xff] }
  0x95   : > { %2843 = vmatprep.mubr.bf16.mxu0 %v374_v43  ;;  %2907 = vmatprep.mubr.bf16.mxu1 %v406_v45  ;;  %v347_v43 = vld [vmem:[%s3251_s22 + $0x3a8] sm:$0xff]  ;;  %v386_v49 = vpack.c.bf16 %v287_v44, %v286_v41 }
  0x96   : > { %v416_v45 = vpack.c.bf16 %v347_v43, %v346_v42 }
  0x9c   : > { %2844 = vmatmul.mubr.bf16.gmra.mrb[32].mxu0 %v375_v54  ;;  %2908 = vmatmul.mubr.bf16.gmra.mrb[32].mxu1 %v407_v56  ;;  %v350_v54 = vld [vmem:[%s3251_s22 + $0x3c0] sm:$0xff]  ;;  %v291_v56 = vld [vmem:[%s3251_s22 + $0x1e8] sm:$0xff] }
  0x9d   : > { %2847 = vmatprep.mubr.bf16.mxu0 %v376_v55  ;;  %2911 = vmatprep.mubr.bf16.mxu1 %v408_v57  ;;  %v351_v55 = vld [vmem:[%s3251_s22 + $0x3c8] sm:$0xff]  ;;  %v388_v61 = vpack.c.bf16 %v291_v56, %v290_v53 }
  0x9e   : > { %v418_v57 = vpack.c.bf16 %v351_v55, %v350_v54 }
  0xa4   : > { %2848 = vmatmul.mubr.bf16.gmra.mrb[36].mxu0 %v377_v2  ;;  %2912 = vmatmul.mubr.bf16.gmra.mrb[36].mxu1 %v409_v4  ;;  %v355_v2 = vld [vmem:[%s3251_s22 + $0x3e8] sm:$0xff]  ;;  %v356_v4 = vld [vmem:[%s3251_s22 + $0x3f0] sm:$0xff] }
  0xa5   : > { %2851 = vmatprep.mubr.bf16.mxu0 %v378_v3  ;;  %2915 = vmatprep.mubr.bf16.mxu1 %v410_v5  ;;  %v420_v3 = vpack.c.bf16 %v355_v2, %v354_v1  ;;  %v357_v5 = vld [vmem:[%s3251_s22 + $0x3f8] sm:$0xff]  ;;  %s2066_s22 = sshll.u32 %s3247_s13, 9 }
  0xa6   : > { %v421_v7 = vpack.c.bf16 %v357_v5, %v356_v4  ;;  %s3439_s12 = scalar_lea.vmem [#allocation5], %s2066_s22 }
  0xa7   : > { %s1958_s29 = sshll.u32 %s3439_s12, 4  ;;  %s3940_s29 = int_to_ptr.vmem [resolvable:$true] %s1958_s29 }
  0xa8   : > { %s3044_s9 = scalar_lea.vmem %s3940_s29, 8192  ;;  %p3051_p8 = scmp.lt.s32.totalorder %s3940_s29, %s3049_s20 }
  0xa9   : > { %p3045_p6 = scmp.ne.s32.totalorder %s3940_s29, %s3044_s9  ;;  %p3052_p10 = scmp.lt.s32.totalorder %s3050_s8, %s3044_s9 }
  0xab   : > { %p3046_p12 = pnand %p3045_p6, %p4222_p11  ;;  %p3053_p0 = por %p3052_p10, %p3051_p8 }
  0xac   : > { %2852 = vmatmul.mubr.bf16.gmra.mrb[40].mxu0 %v379_v12  ;;  %2916 = vmatmul.mubr.bf16.gmra.mrb[40].mxu1 %v411_v14 }
  0xad   : > { %2855 = vmatprep.mubr.bf16.mxu0 %v380_v13  ;;  %2919 = vmatprep.mubr.bf16.mxu1 %v412_v21  ;;  %p3047_p13 = pneg %p3046_p12 }
  0xaf   : > { %p3054_p2 = pnand %p3053_p0, %p3047_p13 }
  0xb4   : > { %2856 = vmatmul.mubr.bf16.gmra.mrb[44].mxu0 %v381_v24  ;;  %2920 = vmatmul.mubr.bf16.gmra.mrb[44].mxu1 %v413_v26 }
  0xb5   : > { %2859 = vmatprep.mubr.bf16.mxu0 %v382_v25  ;;  %2923 = vmatprep.mubr.bf16.mxu1 %v414_v33 }
  0xbc   : > { %2860 = vmatmul.mubr.bf16.gmra.mrb[48].mxu0 %v383_v36  ;;  %2924 = vmatmul.mubr.bf16.gmra.mrb[48].mxu1 %v415_v38 }
  0xbd   : > { %2863 = vmatprep.mubr.bf16.mxu0 %v384_v37  ;;  %2927 = vmatprep.mubr.bf16.mxu1 %v416_v45 }
  0xc4   : > { %2864 = vmatmul.mubr.bf16.gmra.mrb[52].mxu0 %v385_v48  ;;  %2928 = vmatmul.mubr.bf16.gmra.mrb[52].mxu1 %v417_v50 }
  0xc5   : > { %2867 = vmatprep.mubr.bf16.mxu0 %v386_v49  ;;  %2931 = vmatprep.mubr.bf16.mxu1 %v418_v57 }
  0xcc   : > { %2868 = vmatmul.mubr.bf16.gmra.mrb[56].mxu0 %v387_v60  ;;  %2932 = vmatmul.mubr.bf16.gmra.mrb[56].mxu1 %v419_v62 }
  0xcd   : > { %2871 = vmatprep.mubr.bf16.mxu0 %v388_v61  ;;  %2935 = vmatprep.mubr.bf16.mxu1 %v420_v3 }
  0xd4   : > { %2872 = vmatmul.mubr.bf16.gmra.mrb[60].mxu0 %v389_v6  ;;  %2936 = vmatmul.mubr.bf16.gmra.mrb[60].mxu1 %v421_v7 }
 0x12f   : > { %v2813_v9 = vpop.f32.mrb[0].mxu0  ;;  %v2877_v12 = vpop.f32.mrb[0].mxu1 }
 0x130   : > { %v536_v10 = vadd.f32 %v2813_v9, %v3412_v8  ;;  %v527_v11 = vpop.f32.mrb[1].mxu0  ;;  %v3417_v15 = vadd.f32 %v2877_v12, %v3412_v8  ;;  %v783_v16 = vpop.f32.mrb[1].mxu1 }
 0x131   : > { %v528_v13 = vadd.f32 %v3412_v8, %v527_v11  ;;  %v2814_v14 = vpop.f32.mrb[2].mxu0  ;;  %v3422_v19 = vadd.f32 %v3412_v8, %v783_v16  ;;  %v2878_v20 = vpop.f32.mrb[2].mxu1 }
 0x132   : > { %v539_v17 = vadd.f32 %v2814_v14, %v3412_v8  ;;  %v530_v18 = vpop.f32.mrb[3].mxu0  ;;  %v4142_v22 = vmax.f32 %v3417_v15, 0.0  ;;  %v3427_v23 = vadd.f32 %v2878_v20, %v3412_v8  ;;  %v786_v24 = vpop.f32.mrb[3].mxu1  ;;  %v1040_v25 = vmax.f32 %v536_v10, 0.0 }
 0x133   : > { %v531_v21 = vadd.f32 %v3412_v8, %v530_v18  ;;  %v4148_v27 = vmax.f32 %v3422_v19, 0.0  ;;  %v3431_v28 = vadd.f32 %v3412_v8, %v786_v24  ;;  %v1038_v29 = vmax.f32 %v528_v13, 0.0 }
 0x134   : > { %v1041_v26 = vmax.f32 %v539_v17, 0.0  ;;  %v4141_v31 = vmax.f32 %v3427_v23, 0.0 }
 0x135   : > { %v1039_v30 = vmax.f32 %v531_v21, 0.0  ;;  %v4147_v33 = vmax.f32 %v3431_v28, 0.0 }
 0x136   : > { %v2348_v32 = vpack.c.bf16 %v1041_v26, %v1040_v25  ;;  %v2508_v37 = vpack.c.bf16 %v4141_v31, %v4142_v22 }
 0x137   : > { %v2343_v34 = vpack.c.bf16 %v1039_v30, %v1038_v29  ;;  %v1806_v35 = vadd.f32 %v1039_v30, %v1038_v29  ;;  %v2817_v36 = vpop.f32.mrb[4].mxu0  ;;  %v2503_v40 = vpack.c.bf16 %v4147_v33, %v4148_v27  ;;  %v2881_v41 = vpop.f32.mrb[4].mxu1 }
 0x138   : > { %2660 = vst [vmem:[%s3439_s12 + $0x8] sm:$0xff] %v2348_v32   ;;  %v552_v38 = vadd.f32 %v2817_v36, %v3412_v8  ;;  %v543_v39 = vpop.f32.mrb[5].mxu0  ;;  %2692 = vst [vmem:[%s3439_s12 + $0x108] sm:$0xff] %v2508_v37   ;;  %v3451_v45 = vadd.f32 %v2881_v41, %v3412_v8  ;;  %v799_v46 = vpop.f32.mrb[5].mxu1 }
 0x139   : > { %2344 = vst [vmem:[%s3439_s12] sm:$0xff] %v2343_v34   ;;  %v1807_v42 = vadd.f32 %v1806_v35, %v1040_v25  ;;  %v544_v43 = vadd.f32 %v3412_v8, %v543_v39  ;;  %v2818_v44 = vpop.f32.mrb[6].mxu0  ;;  %2691 = vst [vmem:[%s3439_s12 + $0x100] sm:$0xff] %v2503_v40   ;;  %v3456_v50 = vadd.f32 %v3412_v8, %v799_v46  ;;  %v2882_v51 = vpop.f32.mrb[6].mxu1 }
 0x13a   : > { %v1044_v47 = vmax.f32 %v552_v38, 0.0  ;;  %v555_v48 = vadd.f32 %v2818_v44, %v3412_v8  ;;  %v546_v49 = vpop.f32.mrb[7].mxu0  ;;  %v4134_v55 = vmax.f32 %v3451_v45, 0.0  ;;  %v802_v56 = vpop.f32.mrb[7].mxu1  ;;  %v3462_v59 = vadd.f32 %v2882_v51, %v3412_v8 }
 0x13b   : > { %v1808_v52 = vadd.f32 %v1807_v42, %v1041_v26  ;;  %v1042_v53 = vmax.f32 %v544_v43, 0.0  ;;  %v547_v54 = vadd.f32 %v3412_v8, %v546_v49  ;;  %v4140_v58 = vmax.f32 %v3456_v50, 0.0 }
 0x13c   : > { %v1045_v57 = vmax.f32 %v555_v48, 0.0  ;;  %v3465_v60 = vadd.f32 %v3412_v8, %v802_v56  ;;  %v4133_v0 = vmax.f32 %v3462_v59, 0.0 }
 0x13d   : > { %v1809_v61 = vadd.f32 %v1808_v52, %v1042_v53  ;;  %v1043_v62 = vmax.f32 %v547_v54, 0.0 }
 0x13e   : > { %v2358_v63 = vpack.c.bf16 %v1045_v57, %v1044_v47  ;;  %v4139_v1 = vmax.f32 %v3465_v60, 0.0  ;;  %v2518_v7 = vpack.c.bf16 %v4133_v0, %v4134_v55 }
 0x13f   : > { %v2353_v2 = vpack.c.bf16 %v1043_v62, %v1042_v53  ;;  %v1810_v3 = vadd.f32 %v1809_v61, %v1043_v62  ;;  %v2821_v4 = vpop.f32.mrb[8].mxu0  ;;  %v2885_v10 = vpop.f32.mrb[8].mxu1 }
 0x140   : > { %2662 = vst [vmem:[%s3439_s12 + $0x18] sm:$0xff] %v2358_v63   ;;  %v568_v5 = vadd.f32 %v2821_v4, %v3412_v8  ;;  %v559_v6 = vpop.f32.mrb[9].mxu0  ;;  %v2513_v9 = vpack.c.bf16 %v4139_v1, %v4140_v58  ;;  %v3482_v14 = vadd.f32 %v2885_v10, %v3412_v8  ;;  %v815_v16 = vpop.f32.mrb[9].mxu1  ;;  %2694 = vst [vmem:[%s3439_s12 + $0x118] sm:$0xff] %v2518_v7  }
 0x141   : > { %2661 = vst [vmem:[%s3439_s12 + $0x10] sm:$0xff] %v2353_v2   ;;  %v1811_v11 = vadd.f32 %v1810_v3, %v1044_v47  ;;  %v560_v12 = vadd.f32 %v3412_v8, %v559_v6  ;;  %v2822_v13 = vpop.f32.mrb[10].mxu0  ;;  %v3488_v21 = vadd.f32 %v3412_v8, %v815_v16  ;;  %v2886_v24 = vpop.f32.mrb[10].mxu1 }
 0x142   : > { %v1048_v17 = vmax.f32 %v568_v5, 0.0  ;;  %v571_v18 = vadd.f32 %v2822_v13, %v3412_v8  ;;  %v562_v20 = vpop.f32.mrb[11].mxu0  ;;  %2693 = vst [vmem:[%s3439_s12 + $0x110] sm:$0xff] %v2513_v9   ;;  %v4126_v30 = vmax.f32 %v3482_v14, 0.0  ;;  %v818_v32 = vpop.f32.mrb[11].mxu1  ;;  %v3494_v36 = vadd.f32 %v2886_v24, %v3412_v8 }
 0x143   : > { %v1812_v25 = vadd.f32 %v1811_v11, %v1045_v57  ;;  %v1046_v26 = vmax.f32 %v560_v12, 0.0  ;;  %v563_v29 = vadd.f32 %v3412_v8, %v562_v20  ;;  %v4132_v35 = vmax.f32 %v3488_v21, 0.0 }
 0x144   : > { %v1049_v34 = vmax.f32 %v571_v18, 0.0  ;;  %v3497_v37 = vadd.f32 %v3412_v8, %v818_v32  ;;  %v4125_v41 = vmax.f32 %v3494_v36, 0.0 }
 0x145   : > { %v1813_v38 = vadd.f32 %v1812_v25, %v1046_v26  ;;  %v1047_v39 = vmax.f32 %v563_v29, 0.0 }
 0x146   : > { %v2368_v40 = vpack.c.bf16 %v1049_v34, %v1048_v17  ;;  %v4131_v42 = vmax.f32 %v3497_v37, 0.0  ;;  %v2528_v49 = vpack.c.bf16 %v4125_v41, %v4126_v30 }
 0x147   : > { %v2363_v43 = vpack.c.bf16 %v1047_v39, %v1046_v26  ;;  %v1814_v44 = vadd.f32 %v1813_v38, %v1047_v39  ;;  %v2825_v46 = vpop.f32.mrb[12].mxu0  ;;  %v2889_v52 = vpop.f32.mrb[12].mxu1 }
 0x148   : > { %2664 = vst [vmem:[%s3439_s12 + $0x28] sm:$0xff] %v2368_v40   ;;  %v584_v47 = vadd.f32 %v2825_v46, %v3412_v8  ;;  %v575_v48 = vpop.f32.mrb[13].mxu0  ;;  %v2523_v51 = vpack.c.bf16 %v4131_v42, %v4132_v35  ;;  %v3514_v57 = vadd.f32 %v2889_v52, %v3412_v8  ;;  %v831_v61 = vpop.f32.mrb[13].mxu1  ;;  %2696 = vst [vmem:[%s3439_s12 + $0x128] sm:$0xff] %v2528_v49  }
 0x149   : > { %2663 = vst [vmem:[%s3439_s12 + $0x20] sm:$0xff] %v2363_v43   ;;  %v1815_v53 = vadd.f32 %v1814_v44, %v1048_v17  ;;  %v576_v54 = vadd.f32 %v3412_v8, %v575_v48  ;;  %v2826_v56 = vpop.f32.mrb[14].mxu0  ;;  %v3520_v3 = vadd.f32 %v3412_v8, %v831_v61  ;;  %v2890_v4 = vpop.f32.mrb[14].mxu1 }
 0x14a   : > { %v1052_v62 = vmax.f32 %v584_v47, 0.0  ;;  %v587_v63 = vadd.f32 %v2826_v56, %v3412_v8  ;;  %v578_v2 = vpop.f32.mrb[15].mxu0  ;;  %2695 = vst [vmem:[%s3439_s12 + $0x120] sm:$0xff] %v2523_v51   ;;  %v4118_v9 = vmax.f32 %v3514_v57, 0.0  ;;  %v834_v10 = vpop.f32.mrb[15].mxu1  ;;  %v3526_v13 = vadd.f32 %v2890_v4, %v3412_v8 }
 0x14b   : > { %v1816_v5 = vadd.f32 %v1815_v53, %v1049_v34  ;;  %v1050_v6 = vmax.f32 %v576_v54, 0.0  ;;  %v579_v7 = vadd.f32 %v3412_v8, %v578_v2  ;;  %v4124_v12 = vmax.f32 %v3520_v3, 0.0 }
 0x14c   : > { %v1053_v11 = vmax.f32 %v587_v63, 0.0  ;;  %v3529_v16 = vadd.f32 %v3412_v8, %v834_v10  ;;  %v4117_v24 = vmax.f32 %v3526_v13, 0.0 }
 0x14d   : > { %v1817_v17 = vadd.f32 %v1816_v5, %v1050_v6  ;;  %v1051_v18 = vmax.f32 %v579_v7, 0.0 }
 0x14e   : > { %v2378_v20 = vpack.c.bf16 %v1053_v11, %v1052_v62  ;;  %v4123_v25 = vmax.f32 %v3529_v16, 0.0  ;;  %v2538_v39 = vpack.c.bf16 %v4117_v24, %v4118_v9 }
 0x14f   : > { %v2373_v26 = vpack.c.bf16 %v1051_v18, %v1050_v6  ;;  %v1818_v29 = vadd.f32 %v1817_v17, %v1051_v18  ;;  %v2829_v32 = vpop.f32.mrb[16].mxu0  ;;  %v2893_v43 = vpop.f32.mrb[16].mxu1 }
 0x150   : > { %2666 = vst [vmem:[%s3439_s12 + $0x38] sm:$0xff] %v2378_v20   ;;  %v600_v34 = vadd.f32 %v2829_v32, %v3412_v8  ;;  %v591_v38 = vpop.f32.mrb[17].mxu0  ;;  %v2533_v40 = vpack.c.bf16 %v4123_v25, %v4124_v12  ;;  %v3546_v48 = vadd.f32 %v2893_v43, %v3412_v8  ;;  %v847_v49 = vpop.f32.mrb[17].mxu1  ;;  %2698 = vst [vmem:[%s3439_s12 + $0x138] sm:$0xff] %v2538_v39  }
 0x151   : > { %2665 = vst [vmem:[%s3439_s12 + $0x30] sm:$0xff] %v2373_v26   ;;  %v1819_v44 = vadd.f32 %v1818_v29, %v1052_v62  ;;  %v592_v46 = vadd.f32 %v3412_v8, %v591_v38  ;;  %v2830_v47 = vpop.f32.mrb[18].mxu0  ;;  %v3552_v54 = vadd.f32 %v3412_v8, %v847_v49  ;;  %v2894_v56 = vpop.f32.mrb[18].mxu1 }
 0x152   : > { %v1056_v51 = vmax.f32 %v600_v34, 0.0  ;;  %v603_v52 = vadd.f32 %v2830_v47, %v3412_v8  ;;  %v594_v53 = vpop.f32.mrb[19].mxu0  ;;  %2697 = vst [vmem:[%s3439_s12 + $0x130] sm:$0xff] %v2533_v40   ;;  %v4110_v2 = vmax.f32 %v3546_v48, 0.0  ;;  %v850_v4 = vpop.f32.mrb[19].mxu1  ;;  %v3558_v7 = vadd.f32 %v2894_v56, %v3412_v8 }
 0x153   : > { %v1820_v61 = vadd.f32 %v1819_v44, %v1053_v11  ;;  %v1054_v63 = vmax.f32 %v592_v46, 0.0  ;;  %v595_v62 = vadd.f32 %v3412_v8, %v594_v53  ;;  %v4116_v6 = vmax.f32 %v3552_v54, 0.0 }
 0x154   : > { %v1057_v5 = vmax.f32 %v603_v52, 0.0  ;;  %v3561_v10 = vadd.f32 %v3412_v8, %v850_v4  ;;  %v4109_v20 = vmax.f32 %v3558_v7, 0.0 }
 0x155   : > { %v1821_v17 = vadd.f32 %v1820_v61, %v1054_v63  ;;  %v1055_v18 = vmax.f32 %v595_v62, 0.0 }
 0x156   : > { %v2388_v11 = vpack.c.bf16 %v1057_v5, %v1056_v51  ;;  %v4115_v26 = vmax.f32 %v3561_v10, 0.0  ;;  %v2548_v40 = vpack.c.bf16 %v4109_v20, %v4110_v2 }
 0x157   : > { %v2383_v29 = vpack.c.bf16 %v1055_v18, %v1054_v63  ;;  %v1822_v32 = vadd.f32 %v1821_v17, %v1055_v18  ;;  %v2833_v34 = vpop.f32.mrb[20].mxu0  ;;  %v2897_v44 = vpop.f32.mrb[20].mxu1 }
 0x158   : > { %2668 = vst [vmem:[%s3439_s12 + $0x48] sm:$0xff] %v2388_v11   ;;  %v616_v38 = vadd.f32 %v2833_v34, %v3412_v8  ;;  %v607_v39 = vpop.f32.mrb[21].mxu0  ;;  %v2543_v43 = vpack.c.bf16 %v4115_v26, %v4116_v6  ;;  %v3578_v52 = vadd.f32 %v2897_v44, %v3412_v8  ;;  %v863_v53 = vpop.f32.mrb[21].mxu1  ;;  %2700 = vst [vmem:[%s3439_s12 + $0x148] sm:$0xff] %v2548_v40  }
 0x159   : > { %2667 = vst [vmem:[%s3439_s12 + $0x40] sm:$0xff] %v2383_v29   ;;  %v1823_v46 = vadd.f32 %v1822_v32, %v1056_v51  ;;  %v608_v47 = vadd.f32 %v3412_v8, %v607_v39  ;;  %v2834_v49 = vpop.f32.mrb[22].mxu0  ;;  %v3584_v62 = vadd.f32 %v3412_v8, %v863_v53  ;;  %v2898_v4 = vpop.f32.mrb[22].mxu1 }
 0x15a   : > { %v1060_v56 = vmax.f32 %v616_v38, 0.0  ;;  %v619_v61 = vadd.f32 %v2834_v49, %v3412_v8  ;;  %v610_v63 = vpop.f32.mrb[23].mxu0  ;;  %2699 = vst [vmem:[%s3439_s12 + $0x140] sm:$0xff] %v2543_v43   ;;  %v4112_v11 = vmax.f32 %v3578_v52, 0.0  ;;  %v866_v29 = vpop.f32.mrb[23].mxu1  ;;  %v3590_v38 = vadd.f32 %v2898_v4, %v3412_v8 }
 0x15b   : > { %v1824_v17 = vadd.f32 %v1823_v46, %v1057_v5  ;;  %v1058_v18 = vmax.f32 %v608_v47, 0.0  ;;  %v611_v51 = vadd.f32 %v3412_v8, %v610_v63  ;;  %v4114_v34 = vmax.f32 %v3584_v62, 0.0 }
 0x15c   : > { %v1061_v32 = vmax.f32 %v619_v61, 0.0  ;;  %v3593_v39 = vadd.f32 %v3412_v8, %v866_v29  ;;  %v4111_v44 = vmax.f32 %v3590_v38, 0.0 }
 0x15d   : > { %v1825_v40 = vadd.f32 %v1824_v17, %v1058_v18  ;;  %v1059_v43 = vmax.f32 %v611_v51, 0.0 }
 0x15e   : > { %v2398_v5 = vpack.c.bf16 %v1061_v32, %v1060_v56  ;;  %v4113_v46 = vmax.f32 %v3593_v39, 0.0  ;;  %v2558_v4 = vpack.c.bf16 %v4111_v44, %v4112_v11 }
 0x15f   : > { %v2393_v47 = vpack.c.bf16 %v1059_v43, %v1058_v18  ;;  %v1826_v49 = vadd.f32 %v1825_v40, %v1059_v43  ;;  %v2837_v53 = vpop.f32.mrb[24].mxu0  ;;  %v2901_v51 = vpop.f32.mrb[24].mxu1 }
 0x160   : > { %2670 = vst [vmem:[%s3439_s12 + $0x58] sm:$0xff] %v2398_v5   ;;  %v632_v61 = vadd.f32 %v2837_v53, %v3412_v8  ;;  %v623_v63 = vpop.f32.mrb[25].mxu0  ;;  %v2553_v17 = vpack.c.bf16 %v4113_v46, %v4114_v34  ;;  %v3610_v43 = vadd.f32 %v2901_v51, %v3412_v8  ;;  %v879_v5 = vpop.f32.mrb[25].mxu1  ;;  %2702 = vst [vmem:[%s3439_s12 + $0x158] sm:$0xff] %v2558_v4  }
 0x161   : > { %2669 = vst [vmem:[%s3439_s12 + $0x50] sm:$0xff] %v2393_v47   ;;  %v1827_v18 = vadd.f32 %v1826_v49, %v1060_v56  ;;  %v624_v29 = vadd.f32 %v3412_v8, %v623_v63  ;;  %v2838_v40 = vpop.f32.mrb[26].mxu0  ;;  %v3616_v44 = vadd.f32 %v3412_v8, %v879_v5  ;;  %v2902_v11 = vpop.f32.mrb[26].mxu1 }
 0x162   : > { %v1064_v53 = vmax.f32 %v632_v61, 0.0  ;;  %v635_v20 = vadd.f32 %v2838_v40, %v3412_v8  ;;  %v626_v2 = vpop.f32.mrb[27].mxu0  ;;  %2701 = vst [vmem:[%s3439_s12 + $0x150] sm:$0xff] %v2553_v17   ;;  %v4120_v49 = vmax.f32 %v3610_v43, 0.0  ;;  %v882_v63 = vpop.f32.mrb[27].mxu1  ;;  %v3622_v40 = vadd.f32 %v2902_v11, %v3412_v8 }
 0x163   : > { %v1828_v46 = vadd.f32 %v1827_v18, %v1061_v32  ;;  %v1062_v47 = vmax.f32 %v624_v29, 0.0  ;;  %v627_v56 = vadd.f32 %v3412_v8, %v626_v2  ;;  %v4122_v61 = vmax.f32 %v3616_v44, 0.0 }
 0x164   : > { %v1065_v51 = vmax.f32 %v635_v20, 0.0  ;;  %v3625_v4 = vadd.f32 %v3412_v8, %v882_v63  ;;  %v4119_v18 = vmax.f32 %v3622_v40, 0.0 }
 0x165   : > { %v1829_v17 = vadd.f32 %v1828_v46, %v1062_v47  ;;  %v1063_v5 = vmax.f32 %v627_v56, 0.0 }
 0x166   : > { %v2408_v32 = vpack.c.bf16 %v1065_v51, %v1064_v53  ;;  %v4121_v2 = vmax.f32 %v3625_v4, 0.0  ;;  %v2568_v46 = vpack.c.bf16 %v4119_v18, %v4120_v49 }
 0x167   : > { %v2403_v29 = vpack.c.bf16 %v1063_v5, %v1062_v47  ;;  %v1830_v34 = vadd.f32 %v1829_v17, %v1063_v5  ;;  %v2841_v26 = vpop.f32.mrb[28].mxu0  ;;  %v2905_v63 = vpop.f32.mrb[28].mxu1 }
 0x168   : > { %2672 = vst [vmem:[%s3439_s12 + $0x68] sm:$0xff] %v2408_v32   ;;  %v648_v20 = vadd.f32 %v2841_v26, %v3412_v8  ;;  %v639_v11 = vpop.f32.mrb[29].mxu0  ;;  %v2563_v56 = vpack.c.bf16 %v4121_v2, %v4122_v61  ;;  %v3642_v32 = vadd.f32 %v2905_v63, %v3412_v8  ;;  %v895_v26 = vpop.f32.mrb[29].mxu1  ;;  %2704 = vst [vmem:[%s3439_s12 + $0x168] sm:$0xff] %v2568_v46  }
 0x169   : > { %2671 = vst [vmem:[%s3439_s12 + $0x60] sm:$0xff] %v2403_v29   ;;  %v1831_v47 = vadd.f32 %v1830_v34, %v1064_v53  ;;  %v640_v17 = vadd.f32 %v3412_v8, %v639_v11  ;;  %v2842_v5 = vpop.f32.mrb[30].mxu0  ;;  %v3648_v18 = vadd.f32 %v3412_v8, %v895_v26  ;;  %v2906_v49 = vpop.f32.mrb[30].mxu1 }
 0x16a   : > { %v1068_v6 = vmax.f32 %v648_v20, 0.0  ;;  %v651_v24 = vadd.f32 %v2842_v5, %v3412_v8  ;;  %v642_v9 = vpop.f32.mrb[31].mxu0  ;;  %2703 = vst [vmem:[%s3439_s12 + $0x160] sm:$0xff] %v2563_v56   ;;  %v4128_v53 = vmax.f32 %v3642_v32, 0.0  ;;  %v898_v11 = vpop.f32.mrb[31].mxu1  ;;  %v3654_v5 = vadd.f32 %v2906_v49, %v3412_v8 }
 0x16b   : > { %v1832_v2 = vadd.f32 %v1831_v47, %v1065_v51  ;;  %v1066_v29 = vmax.f32 %v640_v17, 0.0  ;;  %v643_v34 = vadd.f32 %v3412_v8, %v642_v9  ;;  %v4130_v20 = vmax.f32 %v3648_v18, 0.0 }
 0x16c   : > { %v1069_v63 = vmax.f32 %v651_v24, 0.0  ;;  %v3657_v46 = vadd.f32 %v3412_v8, %v898_v11  ;;  %v4127_v47 = vmax.f32 %v3654_v5, 0.0 }
 0x16d   : > { %v1833_v56 = vadd.f32 %v1832_v2, %v1066_v29  ;;  %v1067_v26 = vmax.f32 %v643_v34, 0.0 }
 0x16e   : > { %v2418_v51 = vpack.c.bf16 %v1069_v63, %v1068_v6  ;;  %v4129_v9 = vmax.f32 %v3657_v46, 0.0  ;;  %v2578_v2 = vpack.c.bf16 %v4127_v47, %v4128_v53 }
 0x16f   : > { %v2413_v17 = vpack.c.bf16 %v1067_v26, %v1066_v29  ;;  %v1834_v61 = vadd.f32 %v1833_v56, %v1067_v26  ;;  %v2845_v25 = vpop.f32.mrb[32].mxu0  ;;  %v2909_v11 = vpop.f32.mrb[32].mxu1 }
 0x170   : > { %2674 = vst [vmem:[%s3439_s12 + $0x78] sm:$0xff] %v2418_v51   ;;  %v664_v24 = vadd.f32 %v2845_v25, %v3412_v8  ;;  %v655_v49 = vpop.f32.mrb[33].mxu0  ;;  %v2573_v34 = vpack.c.bf16 %v4129_v9, %v4130_v20  ;;  %v3674_v51 = vadd.f32 %v2909_v11, %v3412_v8  ;;  %v911_v25 = vpop.f32.mrb[33].mxu1  ;;  %2706 = vst [vmem:[%s3439_s12 + $0x178] sm:$0xff] %v2578_v2  }
 0x171   : > { %2673 = vst [vmem:[%s3439_s12 + $0x70] sm:$0xff] %v2413_v17   ;;  %v1835_v29 = vadd.f32 %v1834_v61, %v1068_v6  ;;  %v656_v56 = vadd.f32 %v3412_v8, %v655_v49  ;;  %v2846_v26 = vpop.f32.mrb[34].mxu0  ;;  %v3680_v47 = vadd.f32 %v3412_v8, %v911_v25  ;;  %v2910_v53 = vpop.f32.mrb[34].mxu1 }
 0x172   : > { %v1072_v12 = vmax.f32 %v664_v24, 0.0  ;;  %v667_v41 = vadd.f32 %v2846_v26, %v3412_v8  ;;  %v658_v30 = vpop.f32.mrb[35].mxu0  ;;  %2705 = vst [vmem:[%s3439_s12 + $0x170] sm:$0xff] %v2573_v34   ;;  %v4136_v61 = vmax.f32 %v3674_v51, 0.0  ;;  %v914_v49 = vpop.f32.mrb[35].mxu1  ;;  %v3686_v26 = vadd.f32 %v2910_v53, %v3412_v8 }
 0x173   : > { %v1836_v9 = vadd.f32 %v1835_v29, %v1069_v63  ;;  %v1070_v17 = vmax.f32 %v656_v56, 0.0  ;;  %v659_v6 = vadd.f32 %v3412_v8, %v658_v30  ;;  %v4138_v24 = vmax.f32 %v3680_v47, 0.0 }
 0x174   : > { %v1073_v11 = vmax.f32 %v667_v41, 0.0  ;;  %v3689_v2 = vadd.f32 %v3412_v8, %v914_v49  ;;  %v4135_v29 = vmax.f32 %v3686_v26, 0.0 }
 0x175   : > { %v1837_v34 = vadd.f32 %v1836_v9, %v1070_v17  ;;  %v1071_v25 = vmax.f32 %v659_v6, 0.0 }
 0x176   : > { %v2428_v63 = vpack.c.bf16 %v1073_v11, %v1072_v12  ;;  %v4137_v30 = vmax.f32 %v3689_v2, 0.0  ;;  %v2588_v9 = vpack.c.bf16 %v4135_v29, %v4136_v61 }
 0x177   : > { %v2423_v56 = vpack.c.bf16 %v1071_v25, %v1070_v17  ;;  %v1838_v20 = vadd.f32 %v1837_v34, %v1071_v25  ;;  %v2849_v42 = vpop.f32.mrb[36].mxu0  ;;  %v2913_v49 = vpop.f32.mrb[36].mxu1 }
 0x178   : > { %2676 = vst [vmem:[%s3439_s12 + $0x88] sm:$0xff] %v2428_v63   ;;  %v680_v41 = vadd.f32 %v2849_v42, %v3412_v8  ;;  %v671_v53 = vpop.f32.mrb[37].mxu0  ;;  %v2583_v6 = vpack.c.bf16 %v4137_v30, %v4138_v24  ;;  %v3706_v63 = vadd.f32 %v2913_v49, %v3412_v8  ;;  %v927_v42 = vpop.f32.mrb[37].mxu1  ;;  %2708 = vst [vmem:[%s3439_s12 + $0x188] sm:$0xff] %v2588_v9  }
 0x179   : > { %2675 = vst [vmem:[%s3439_s12 + $0x80] sm:$0xff] %v2423_v56   ;;  %v1839_v17 = vadd.f32 %v1838_v20, %v1072_v12  ;;  %v672_v34 = vadd.f32 %v3412_v8, %v671_v53  ;;  %v2850_v25 = vpop.f32.mrb[38].mxu0  ;;  %v3712_v29 = vadd.f32 %v3412_v8, %v927_v42  ;;  %v2914_v61 = vpop.f32.mrb[38].mxu1 }
 0x17a   : > { %4187 = vst [vmem:[#allocation8_spill] sm:$0xff] %v3706_v63  ;;  %v1076_v35 = vmax.f32 %v680_v41, 0.0  ;;  %v683_v0 = vadd.f32 %v2850_v25, %v3412_v8  ;;  %v674_v55 = vpop.f32.mrb[39].mxu0  ;;  %2707 = vst [vmem:[%s3439_s12 + $0x180] sm:$0xff] %v2583_v6   ;;  %v4144_v20 = vmax.f32 %v3706_v63, 0.0  ;;  %v930_v53 = vpop.f32.mrb[39].mxu1  ;;  %v3718_v25 = vadd.f32 %v2914_v61, %v3412_v8 }
 0x17b   : > { %v1840_v30 = vadd.f32 %v1839_v17, %v1073_v11  ;;  %v1074_v56 = vmax.f32 %v672_v34, 0.0  ;;  %v675_v12 = vadd.f32 %v3412_v8, %v674_v55  ;;  %v4146_v41 = vmax.f32 %v3712_v29, 0.0 }
 0x17c   : > { %v1077_v49 = vmax.f32 %v683_v0, 0.0  ;;  %4188 = vst [vmem:[#allocation9_spill] sm:$0xff] %v3718_v25  ;;  %v3721_v9 = vadd.f32 %v3412_v8, %v930_v53  ;;  %v4143_v17 = vmax.f32 %v3718_v25, 0.0 }
 0x17d   : > { %v1841_v6 = vadd.f32 %v1840_v30, %v1074_v56  ;;  %v1075_v42 = vmax.f32 %v675_v12, 0.0 }
 0x17e   : > { %v2438_v11 = vpack.c.bf16 %v1077_v49, %v1076_v35  ;;  %v4145_v55 = vmax.f32 %v3721_v9, 0.0  ;;  %v2598_v30 = vpack.c.bf16 %v4143_v17, %v4144_v20 }
 0x17f   : > { %v2433_v34 = vpack.c.bf16 %v1075_v42, %v1074_v56  ;;  %v1842_v24 = vadd.f32 %v1841_v6, %v1075_v42  ;;  %v2853_v1 = vpop.f32.mrb[40].mxu0  ;;  %v2917_v53 = vpop.f32.mrb[40].mxu1 }
 0x180   : > { %2678 = vst [vmem:[%s3439_s12 + $0x98] sm:$0xff] %v2438_v11   ;;  %v696_v0 = vadd.f32 %v2853_v1, %v3412_v8  ;;  %v687_v61 = vpop.f32.mrb[41].mxu0  ;;  %v2593_v12 = vpack.c.bf16 %v4145_v55, %v4146_v41  ;;  %v3738_v11 = vadd.f32 %v2917_v53, %v3412_v8  ;;  %v943_v1 = vpop.f32.mrb[41].mxu1  ;;  %2710 = vst [vmem:[%s3439_s12 + $0x198] sm:$0xff] %v2598_v30  }
 0x181   : > { %2677 = vst [vmem:[%s3439_s12 + $0x90] sm:$0xff] %v2433_v34   ;;  %v1843_v56 = vadd.f32 %v1842_v24, %v1076_v35  ;;  %v688_v6 = vadd.f32 %v3412_v8, %v687_v61  ;;  %v2854_v42 = vpop.f32.mrb[42].mxu0  ;;  %v3744_v17 = vadd.f32 %v3412_v8, %v943_v1  ;;  %v2918_v20 = vpop.f32.mrb[42].mxu1 }
 0x182   : > { %4189 = vst [vmem:[#allocation10_spill] sm:$0xff] %v3738_v11  ;;  %v1080_v58 = vmax.f32 %v696_v0, 0.0  ;;  %v699_v31 = vadd.f32 %v2854_v42, %v3412_v8  ;;  %v690_v22 = vpop.f32.mrb[43].mxu0  ;;  %2709 = vst [vmem:[%s3439_s12 + $0x190] sm:$0xff] %v2593_v12   ;;  %v4152_v24 = vmax.f32 %v3738_v11, 0.0  ;;  %v946_v61 = vpop.f32.mrb[43].mxu1  ;;  %v3750_v42 = vadd.f32 %v2918_v20, %v3412_v8 }
 0x183   : > { %4190 = vst [vmem:[#allocation11_spill] sm:$0xff] %v3744_v17  ;;  %v1844_v55 = vadd.f32 %v1843_v56, %v1077_v49  ;;  %v1078_v34 = vmax.f32 %v688_v6, 0.0  ;;  %v691_v35 = vadd.f32 %v3412_v8, %v690_v22  ;;  %v4154_v0 = vmax.f32 %v3744_v17, 0.0 }
 0x184   : > { %v1081_v53 = vmax.f32 %v699_v31, 0.0  ;;  %4191 = vst [vmem:[#allocation12_spill] sm:$0xff] %v3750_v42  ;;  %v3753_v30 = vadd.f32 %v3412_v8, %v946_v61  ;;  %v4151_v56 = vmax.f32 %v3750_v42, 0.0 }
 0x185   : > { %v1845_v12 = vadd.f32 %v1844_v55, %v1078_v34  ;;  %v1079_v1 = vmax.f32 %v691_v35, 0.0 }
 0x186   : > { %4192 = vst [vmem:[#allocation13_spill] sm:$0xff] %v3753_v30  ;;  %v2448_v49 = vpack.c.bf16 %v1081_v53, %v1080_v58  ;;  %v4153_v22 = vmax.f32 %v3753_v30, 0.0  ;;  %v2608_v55 = vpack.c.bf16 %v4151_v56, %v4152_v24 }
 0x187   : > { %v2443_v6 = vpack.c.bf16 %v1079_v1, %v1078_v34  ;;  %v1846_v41 = vadd.f32 %v1845_v12, %v1079_v1  ;;  %v2857_v33 = vpop.f32.mrb[44].mxu0  ;;  %v2921_v61 = vpop.f32.mrb[44].mxu1 }
 0x188   : > { %2680 = vst [vmem:[%s3439_s12 + $0xa8] sm:$0xff] %v2448_v49   ;;  %v712_v31 = vadd.f32 %v2857_v33, %v3412_v8  ;;  %v703_v20 = vpop.f32.mrb[45].mxu0  ;;  %v2603_v35 = vpack.c.bf16 %v4153_v22, %v4154_v0  ;;  %v3770_v49 = vadd.f32 %v2921_v61, %v3412_v8  ;;  %v959_v33 = vpop.f32.mrb[45].mxu1  ;;  %2712 = vst [vmem:[%s3439_s12 + $0x1a8] sm:$0xff] %v2608_v55  }
 0x189   : > { %2679 = vst [vmem:[%s3439_s12 + $0xa0] sm:$0xff] %v2443_v6   ;;  %v1847_v34 = vadd.f32 %v1846_v41, %v1080_v58  ;;  %v704_v12 = vadd.f32 %v3412_v8, %v703_v20  ;;  %v2858_v1 = vpop.f32.mrb[46].mxu0  ;;  %v3776_v56 = vadd.f32 %v3412_v8, %v959_v33  ;;  %v2922_v24 = vpop.f32.mrb[46].mxu1 }
 0x18a   : > { %4193 = vst [vmem:[#allocation14_spill] sm:$0xff] %v3770_v49  ;;  %v1084_v27 = vmax.f32 %v712_v31, 0.0  ;;  %v715_v11 = vadd.f32 %v2858_v1, %v3412_v8  ;;  %v706_v42 = vpop.f32.mrb[47].mxu0  ;;  %2711 = vst [vmem:[%s3439_s12 + $0x1a0] sm:$0xff] %v2603_v35   ;;  %v962_v20 = vpop.f32.mrb[47].mxu1  ;;  %v3782_v1 = vadd.f32 %v2922_v24, %v3412_v8  ;;  %v4197_v31 = vmax.f32 %v3770_v49, 0.0 }
 0x18b   : > { %4194 = vst [vmem:[#allocation15_spill] sm:$0xff] %v3776_v56  ;;  %v1848_v22 = vadd.f32 %v1847_v34, %v1081_v53  ;;  %v1082_v6 = vmax.f32 %v704_v12, 0.0  ;;  %v707_v58 = vadd.f32 %v3412_v8, %v706_v42  ;;  %v3785_v55 = vadd.f32 %v3412_v8, %v962_v20 }
 0x18c   : > { %v1085_v61 = vmax.f32 %v715_v11, 0.0  ;;  %4195 = vst [vmem:[#allocation16_spill] sm:$0xff] %v3782_v1  ;;  %v4159_v34 = vmax.f32 %v3782_v1, 0.0 }
 0x18d   : > { %4196 = vst [vmem:[#allocation17_spill] sm:$0xff] %v3785_v55  ;;  %v1849_v35 = vadd.f32 %v1848_v22, %v1082_v6  ;;  %v1083_v33 = vmax.f32 %v707_v58, 0.0  ;;  %v4160_v42 = vmax.f32 %v3785_v55, 0.0  ;;  %v4198_v58 = vmax.f32 %v3776_v56, 0.0 }
 0x18e   : > { %v2458_v53 = vpack.c.bf16 %v1085_v61, %v1084_v27  ;;  %v2618_v22 = vpack.c.bf16 %v4159_v34, %v4197_v31 }
 0x18f   : > { %v2453_v12 = vpack.c.bf16 %v1083_v33, %v1082_v6  ;;  %v1850_v0 = vadd.f32 %v1849_v35, %v1083_v33  ;;  %v2861_v41 = vpop.f32.mrb[48].mxu0  ;;  %v2613_v20 = vpack.c.bf16 %v4160_v42, %v4198_v58  ;;  %v2925_v30 = vpop.f32.mrb[48].mxu1 }
 0x190   : > { %2682 = vst [vmem:[%s3439_s12 + $0xb8] sm:$0xff] %v2458_v53   ;;  %v728_v11 = vadd.f32 %v2861_v41, %v3412_v8  ;;  %v719_v24 = vpop.f32.mrb[49].mxu0  ;;  %v3802_v53 = vadd.f32 %v2925_v30, %v3412_v8  ;;  %v975_v41 = vpop.f32.mrb[49].mxu1  ;;  %2714 = vst [vmem:[%s3439_s12 + $0x1b8] sm:$0xff] %v2618_v22  }
 0x191   : > { %2681 = vst [vmem:[%s3439_s12 + $0xb0] sm:$0xff] %v2453_v12   ;;  %v1851_v6 = vadd.f32 %v1850_v0, %v1084_v27  ;;  %v720_v35 = vadd.f32 %v3412_v8, %v719_v24  ;;  %v2862_v33 = vpop.f32.mrb[50].mxu0  ;;  %2713 = vst [vmem:[%s3439_s12 + $0x1b0] sm:$0xff] %v2613_v20   ;;  %v3808_v31 = vadd.f32 %v3412_v8, %v975_v41  ;;  %v2926_v58 = vpop.f32.mrb[50].mxu1 }
 0x192   : > { %4199 = vst [vmem:[#allocation18_spill] sm:$0xff] %v3802_v53  ;;  %v1088_v17 = vmax.f32 %v728_v11, 0.0  ;;  %v731_v49 = vadd.f32 %v2862_v33, %v3412_v8  ;;  %v722_v1 = vpop.f32.mrb[51].mxu0  ;;  %v978_v30 = vpop.f32.mrb[51].mxu1  ;;  %v3814_v33 = vadd.f32 %v2926_v58, %v3412_v8  ;;  %v4203_v11 = vmax.f32 %v3802_v53, 0.0 }
 0x193   : > { %4200 = vst [vmem:[#allocation19_spill] sm:$0xff] %v3808_v31  ;;  %v1852_v34 = vadd.f32 %v1851_v6, %v1085_v61  ;;  %v1086_v12 = vmax.f32 %v720_v35, 0.0  ;;  %v723_v27 = vadd.f32 %v3412_v8, %v722_v1  ;;  %v3817_v22 = vadd.f32 %v3412_v8, %v978_v30 }
 0x194   : > { %v1089_v24 = vmax.f32 %v731_v49, 0.0  ;;  %4201 = vst [vmem:[#allocation20_spill] sm:$0xff] %v3814_v33  ;;  %v4165_v6 = vmax.f32 %v3814_v33, 0.0 }
 0x195   : > { %4202 = vst [vmem:[#allocation21_spill] sm:$0xff] %v3817_v22  ;;  %v1853_v20 = vadd.f32 %v1852_v34, %v1086_v12  ;;  %v1087_v41 = vmax.f32 %v723_v27, 0.0  ;;  %v4166_v1 = vmax.f32 %v3817_v22, 0.0  ;;  %v4204_v27 = vmax.f32 %v3808_v31, 0.0 }
 0x196   : > { %v2468_v61 = vpack.c.bf16 %v1089_v24, %v1088_v17  ;;  %v2628_v34 = vpack.c.bf16 %v4165_v6, %v4203_v11 }
 0x197   : > { %v2463_v35 = vpack.c.bf16 %v1087_v41, %v1086_v12  ;;  %v1854_v42 = vadd.f32 %v1853_v20, %v1087_v41  ;;  %v2865_v0 = vpop.f32.mrb[52].mxu0  ;;  %v2623_v30 = vpack.c.bf16 %v4166_v1, %v4204_v27  ;;  %v2929_v55 = vpop.f32.mrb[52].mxu1 }
 0x198   : > { %2684 = vst [vmem:[%s3439_s12 + $0xc8] sm:$0xff] %v2468_v61   ;;  %v744_v49 = vadd.f32 %v2865_v0, %v3412_v8  ;;  %v735_v58 = vpop.f32.mrb[53].mxu0  ;;  %v3834_v61 = vadd.f32 %v2929_v55, %v3412_v8  ;;  %v991_v0 = vpop.f32.mrb[53].mxu1  ;;  %2716 = vst [vmem:[%s3439_s12 + $0x1c8] sm:$0xff] %v2628_v34  }
 0x199   : > { %2683 = vst [vmem:[%s3439_s12 + $0xc0] sm:$0xff] %v2463_v35   ;;  %v1855_v12 = vadd.f32 %v1854_v42, %v1088_v17  ;;  %v736_v20 = vadd.f32 %v3412_v8, %v735_v58  ;;  %v2866_v41 = vpop.f32.mrb[54].mxu0  ;;  %2715 = vst [vmem:[%s3439_s12 + $0x1c0] sm:$0xff] %v2623_v30   ;;  %v3840_v11 = vadd.f32 %v3412_v8, %v991_v0  ;;  %v2930_v27 = vpop.f32.mrb[54].mxu1 }
 0x19a   : > { %4205 = vst [vmem:[#allocation22_spill] sm:$0xff] %v3834_v61  ;;  %v1092_v56 = vmax.f32 %v744_v49, 0.0  ;;  %v747_v53 = vadd.f32 %v2866_v41, %v3412_v8  ;;  %v738_v33 = vpop.f32.mrb[55].mxu0  ;;  %v994_v55 = vpop.f32.mrb[55].mxu1  ;;  %v3846_v41 = vadd.f32 %v2930_v27, %v3412_v8  ;;  %v4209_v49 = vmax.f32 %v3834_v61, 0.0 }
 0x19b   : > { %4206 = vst [vmem:[#allocation23_spill] sm:$0xff] %v3840_v11  ;;  %v1856_v6 = vadd.f32 %v1855_v12, %v1089_v24  ;;  %v1090_v35 = vmax.f32 %v736_v20, 0.0  ;;  %v739_v17 = vadd.f32 %v3412_v8, %v738_v33  ;;  %v3849_v34 = vadd.f32 %v3412_v8, %v994_v55 }
 0x19c   : > { %v1093_v58 = vmax.f32 %v747_v53, 0.0  ;;  %4207 = vst [vmem:[#allocation24_spill] sm:$0xff] %v3846_v41  ;;  %v4169_v12 = vmax.f32 %v3846_v41, 0.0 }
 0x19d   : > { %4208 = vst [vmem:[#allocation25_spill] sm:$0xff] %v3849_v34  ;;  %v1857_v30 = vadd.f32 %v1856_v6, %v1090_v35  ;;  %v1091_v0 = vmax.f32 %v739_v17, 0.0  ;;  %v4171_v33 = vmax.f32 %v3849_v34, 0.0  ;;  %v4210_v17 = vmax.f32 %v3840_v11, 0.0 }
 0x19e   : > { %v2478_v24 = vpack.c.bf16 %v1093_v58, %v1092_v56  ;;  %v2638_v6 = vpack.c.bf16 %v4169_v12, %v4209_v49  ;;  %v3013_v49 = vld [vmem:[%s4105_s2] ss:$0 sm:$0xff] }
 0x19f   : > { %v2473_v20 = vpack.c.bf16 %v1091_v0, %v1090_v35  ;;  %v1858_v1 = vadd.f32 %v1857_v30, %v1091_v0  ;;  %v2869_v42 = vpop.f32.mrb[56].mxu0  ;;  %v2633_v55 = vpack.c.bf16 %v4171_v33, %v4210_v17  ;;  %v2933_v22 = vpop.f32.mrb[56].mxu1 }
 0x1a0   : > { %2686 = vst [vmem:[%s3439_s12 + $0xd8] sm:$0xff] %v2478_v24   ;;  %v760_v53 = vadd.f32 %v2869_v42, %v3412_v8  ;;  %v751_v27 = vpop.f32.mrb[57].mxu0  ;;  %v3866_v42 = vadd.f32 %v2933_v22, %v3412_v8  ;;  %v1007_v24 = vpop.f32.mrb[57].mxu1  ;;  %2718 = vst [vmem:[%s3439_s12 + $0x1d8] sm:$0xff] %v2638_v6  }
 0x1a1   : > { %2685 = vst [vmem:[%s3439_s12 + $0xd0] sm:$0xff] %v2473_v20   ;;  %v1859_v35 = vadd.f32 %v1858_v1, %v1092_v56  ;;  %v752_v30 = vadd.f32 %v3412_v8, %v751_v27  ;;  %v2870_v0 = vpop.f32.mrb[58].mxu0  ;;  %2717 = vst [vmem:[%s3439_s12 + $0x1d0] sm:$0xff] %v2633_v55   ;;  %v3873_v17 = vadd.f32 %v3013_v49, %v1007_v24  ;;  %v2934_v20 = vpop.f32.mrb[58].mxu1 }
 0x1a2   : > { %4211 = vst [vmem:[#allocation26_spill] sm:$0xff] %v3866_v42  ;;  %v1096_v31 = vmax.f32 %v760_v53, 0.0  ;;  %v763_v12 = vadd.f32 %v3013_v49, %v2870_v0  ;;  %v754_v41 = vpop.f32.mrb[59].mxu0  ;;  %v4179_v8 = vmax.f32 %v3866_v42, 0.0  ;;  %v1010_v22 = vpop.f32.mrb[59].mxu1  ;;  %v3877_v61 = vadd.f32 %v3013_v49, %v2934_v20 }
 0x1a3   : > { %v1860_v56 = vadd.f32 %v1859_v35, %v1093_v58  ;;  %v1094_v1 = vmax.f32 %v752_v30, 0.0  ;;  %v755_v27 = vadd.f32 %v3013_v49, %v754_v41  ;;  %v3879_v0 = vadd.f32 %v3013_v49, %v1010_v22 }
 0x1a4   : > { %v1097_v33 = vmax.f32 %v763_v12, 0.0  ;;  %4212 = vst [vmem:[#allocation27_spill] sm:$0xff] %v3877_v61  ;;  %v4178_v34 = vmax.f32 %v3877_v61, 0.0 }
 0x1a5   : > { %v1861_v6 = vadd.f32 %v1860_v56, %v1094_v1  ;;  %v1095_v55 = vmax.f32 %v755_v27, 0.0  ;;  %v1159_v58 = vmax.f32 %v3879_v0, 0.0  ;;  %v4213_v56 = vmax.f32 %v3873_v17, 0.0 }
 0x1a6   : > { %v2488_v24 = vpack.c.bf16 %v1097_v33, %v1096_v31  ;;  %v2648_v20 = vpack.c.bf16 %v4178_v34, %v4179_v8 }
 0x1a7   : > { %v2483_v35 = vpack.c.bf16 %v1095_v55, %v1094_v1  ;;  %v1862_v41 = vadd.f32 %v1861_v6, %v1095_v55  ;;  %v2873_v30 = vpop.f32.mrb[60].mxu0  ;;  %v2643_v27 = vpack.c.bf16 %v1159_v58, %v4213_v56  ;;  %v2937_v22 = vpop.f32.mrb[60].mxu1 }
 0x1a8   : > { %2688 = vst [vmem:[%s3439_s12 + $0xe8] sm:$0xff] %v2488_v24   ;;  %v776_v12 = vadd.f32 %v3013_v49, %v2873_v30  ;;  %v767_v53 = vpop.f32.mrb[61].mxu0  ;;  %v3893_v11 = vadd.f32 %v3013_v49, %v2937_v22  ;;  %v1023_v24 = vpop.f32.mrb[61].mxu1  ;;  %2720 = vst [vmem:[%s3439_s12 + $0x1e8] sm:$0xff] %v2648_v20  }
 0x1a9   : > { %2687 = vst [vmem:[%s3439_s12 + $0xe0] sm:$0xff] %v2483_v35   ;;  %v1863_v1 = vadd.f32 %v1862_v41, %v1096_v31  ;;  %v768_v6 = vadd.f32 %v3013_v49, %v767_v53  ;;  %v2874_v55 = vpop.f32.mrb[62].mxu0  ;;  %2719 = vst [vmem:[%s3439_s12 + $0x1e0] sm:$0xff] %v2643_v27   ;;  %v3897_v61 = vadd.f32 %v3013_v49, %v1023_v24  ;;  %v2938_v34 = vpop.f32.mrb[62].mxu1 }
 0x1aa   : > { %v1100_v30 = vmax.f32 %v776_v12, 0.0  ;;  %v779_v25 = vadd.f32 %v3013_v49, %v2874_v55  ;;  %v770_v63 = vpop.f32.mrb[63].mxu0  ;;  %v1164_v35 = vmax.f32 %v3893_v11, 0.0  ;;  %v1026_v31 = vpop.f32.mrb[63].mxu1  ;;  %v3901_v12 = vadd.f32 %v3013_v49, %v2938_v34 }
 0x1ab   : > { %v1864_v8 = vadd.f32 %v1863_v1, %v1097_v33  ;;  %v1098_v42 = vmax.f32 %v768_v6, 0.0  ;;  %v771_v56 = vadd.f32 %v3013_v49, %v770_v63  ;;  %v1162_v41 = vmax.f32 %v3897_v61, 0.0 }
 0x1ac   : > { %v1101_v53 = vmax.f32 %v779_v25, 0.0  ;;  %v3903_v20 = vadd.f32 %v3013_v49, %v1026_v31  ;;  %v4181_v33 = vmax.f32 %v3901_v12, 0.0 }
 0x1ad   : > { %v1865_v27 = vadd.f32 %v1864_v8, %v1098_v42  ;;  %v1099_v22 = vmax.f32 %v771_v56, 0.0  ;;  %v4214_v8 = vmax.f32 %v3422_v19, 0.0  ;;  %v4215_v56 = vmax.f32 %v3431_v28, 0.0 }
 0x1ae   : > { %v2498_v55 = vpack.c.bf16 %v1101_v53, %v1100_v30  ;;  %v1163_v63 = vmax.f32 %v3903_v20, 0.0  ;;  %v2658_v25 = vpack.c.bf16 %v4181_v33, %v1164_v35  ;;  %v4220_v19 = vmax.f32 %v3451_v45, 0.0 }
 0x1af   : > { %v2493_v1 = vpack.c.bf16 %v1099_v22, %v1098_v42  ;;  %v1866_v6 = vadd.f32 %v1865_v27, %v1099_v22  ;;  %v4216_v27 = vmax.f32 %v3417_v15, 0.0 }
 0x1b0   : > { %2690 = vst [vmem:[%s3439_s12 + $0xf8] sm:$0xff] %v2498_v55   ;;  %v2653_v34 = vpack.c.bf16 %v1163_v63, %v1162_v41  ;;  %2722 = vst [vmem:[%s3439_s12 + $0x1f8] sm:$0xff] %v2658_v25   ;;  %v4217_v55 = vmax.f32 %v3427_v23, 0.0  ;;  %v4221_v23 = vmax.f32 %v3462_v59, 0.0 }
 0x1b1   : > { %2689 = vst [vmem:[%s3439_s12 + $0xf0] sm:$0xff] %v2493_v1   ;;  %v1867_v49 = vadd.f32 %v1866_v6, %v1100_v30  ;;  %v4218_v1 = vmax.f32 %v3456_v50, 0.0  ;;  %v4219_v6 = vmax.f32 %v3465_v60, 0.0 }
 0x1b2   : > { %2721 = vst [vmem:[%s3439_s12 + $0x1f0] sm:$0xff] %v2653_v34  }
 0x1b3   : > { %v1868_v42 = vadd.f32 %v1867_v49, %v1101_v53 }
 0x1b5   : > { %v1869_v24 = vadd.f32 %v1868_v42, %v4214_v8 }
 0x1b7   : > { %v1870_v31 = vadd.f32 %v1869_v24, %v4215_v56 }
 0x1b9   : > { %v1871_v22 = vadd.f32 %v1870_v31, %v4216_v27 }
 0x1bb   : > { %v1872_v33 = vadd.f32 %v1871_v22, %v4217_v55 }
 0x1bd   : > { %v1873_v30 = vadd.f32 %v1872_v33, %v4218_v1 }
 0x1bf   : > { %v1874_v25 = vadd.f32 %v1873_v30, %v4219_v6 }
 0x1c1   : > { %v1875_v15 = vadd.f32 %v1874_v25, %v4220_v19 }
 0x1c3   : > { %v1876_v28 = vadd.f32 %v1875_v15, %v4221_v23 }
 0x1c4   : > { %3057 = shalt.err (!%p3054_p2)
}
 0x1c5   : > { %s3058_s10 = scalar_lea.hbm %s3936_s6, 8192  ;;  %s3062_s12 = scalar_lea.hbm %s4106_s3, 16384 }
 0x1c6   : > { %p3059_p4 = scmp.ne.s32.totalorder %s3936_s6, %s3058_s10  ;;  %p3063_p9 = scmp.lt.u32.totalorder %s3936_s6, %s4106_s3 }
 0x1c7   : > { %p3064_p1 = scmp.lt.u32.totalorder %s3062_s12, %s3058_s10  ;;  %p3066_p6 = scmp.lt.u32.totalorder %s3058_s10, %s3936_s6 }
 0x1c8   : > { %p3060_p5 = pnand %p3059_p4, %p4222_p11 }
 0x1c9   : > { %p3065_p3 = por %p3064_p1, %p3063_p9 }
 0x1ca   : > { %p3061_p7 = pneg %p3060_p5 }
 0x1cb   : > { %p3067_p12 = por %p3066_p6, %p3065_p3 }
 0x1cd   : > { %p3068_p13 = pnand %p3067_p12, %p3061_p7 }
 0x1cf   : > { %3071 = shalt.err (!%p3068_p13)
}
 0x1d0   : > { %s3116_s26 = smov 64   ;;  %s3117_s30 = smov 4   ;;  %v4223_v45 = vmax.f32 %v3488_v21, 0.0  ;;  %v4224_v59 = vmax.f32 %v3497_v37, 0.0  ;;  %v4225_v53 = vmax.f32 %v3482_v14, 0.0  ;;  %v4226_v34 = vmax.f32 %v3494_v36, 0.0 }
 0x1d1   : > { %2957 = dma.vmem_to_hbm [thread:$0]  (%p4222_p11), %s3940_s29, 8192, %s3936_s6, %s1941_s7, %s3116_s26, %s3116_s26, %s3117_s30   ;;  %v4227_v42 = vmax.f32 %v3520_v3, 0.0  ;;  %v4228_v24 = vmax.f32 %v3529_v16, 0.0  ;;  %v4229_v31 = vmax.f32 %v3514_v57, 0.0  ;;  %v4230_v21 = vmax.f32 %v3526_v13, 0.0 }
 0x1d2   : > { %v1877_v50 = vadd.f32 %v1876_v28, %v4223_v45  ;;  %v4231_v37 = vmax.f32 %v3552_v54, 0.0  ;;  %v4232_v14 = vmax.f32 %v3561_v10, 0.0  ;;  %v4233_v36 = vmax.f32 %v3546_v48, 0.0  ;;  %p225_p11 = scmp.lt.s32.totalorder %s3164_s19, 1 }
 0x1d3   : > { %v4234_v3 = vmax.f32 %v3558_v7, 0.0  ;;  %v4235_v16 = vmax.f32 %v3584_v62, 0.0  ;;  %v4236_v57 = vmax.f32 %v3593_v39, 0.0  ;;  %v4237_v13 = vmax.f32 %v3578_v52, 0.0 }
 0x1d4   : > { %v1878_v60 = vadd.f32 %v1877_v50, %v4224_v59  ;;  %v4238_v54 = vmax.f32 %v3590_v38, 0.0  ;;  %v4239_v10 = vmax.f32 %v3616_v44, 0.0  ;;  %v4240_v48 = vmax.f32 %v3625_v4, 0.0  ;;  %s4302_s19 = smov (!%p225_p11, %s3164_s19), 1 }
 0x1d5   : > { %v4241_v7 = vmax.f32 %v3610_v43, 0.0  ;;  %v4242_v62 = vmax.f32 %v3622_v40, 0.0  ;;  %v4243_v39 = vmax.f32 %v3648_v18, 0.0  ;;  %v4244_v52 = vmax.f32 %v3657_v46, 0.0  ;;  %s2067_s27 = sshll.u32 %s4302_s19, 3 }
 0x1d6   : > { %v1879_v33 = vadd.f32 %v1878_v60, %v4225_v53  ;;  %v4245_v38 = vmax.f32 %v3642_v32, 0.0  ;;  %v4246_v44 = vmax.f32 %v3654_v5, 0.0  ;;  %v4247_v4 = vmax.f32 %v3680_v47, 0.0  ;;  %v4253_v5 = vld [vmem:[#allocation8_spill] sm:$0xff]  ;;  %v4255_v47 = vld [vmem:[#allocation9_spill] sm:$0xff]  ;;  %s228_s5 = scalar_lea.vmem %s4107_s4, %s2067_s27 }
 0x1d7   : > { %v4248_v43 = vmax.f32 %v3689_v2, 0.0  ;;  %v4249_v40 = vmax.f32 %v3674_v51, 0.0  ;;  %v4250_v18 = vmax.f32 %v3686_v26, 0.0  ;;  %v4251_v46 = vmax.f32 %v3712_v29, 0.0  ;;  %v4257_v2 = vld [vmem:[#allocation11_spill] sm:$0xff]  ;;  %v4259_v51 = vld [vmem:[#allocation13_spill] sm:$0xff] }
 0x1d8   : > { %v1880_v49 = vadd.f32 %v1879_v33, %v4226_v34  ;;  %v4252_v32 = vmax.f32 %v3721_v9, 0.0  ;;  %v4261_v26 = vld [vmem:[#allocation10_spill] sm:$0xff]  ;;  %v4263_v29 = vld [vmem:[#allocation12_spill] sm:$0xff]  ;;  %v4265_v9 = vld [vmem:[#allocation15_spill] sm:$0xff] }
 0x1da   : > { %v1881_v8 = vadd.f32 %v1880_v49, %v4227_v42 }
 0x1dc   : > { %v1882_v56 = vadd.f32 %v1881_v8, %v4228_v24 }
 0x1de   : > { %v1883_v27 = vadd.f32 %v1882_v56, %v4229_v31 }
 0x1e0   : > { %v1884_v22 = vadd.f32 %v1883_v27, %v4230_v21  ;;  %v4254_v27 = vmax.f32 %v4253_v5, 0.0  ;;  %v4289_v5 = vmax.f32 %v3873_v17, 0.0  ;;  %v4294_v17 = vmax.f32 %v3901_v12, 0.0 }
 0x1e2   : > { %v1885_v55 = vadd.f32 %v1884_v22, %v4231_v37  ;;  %v4256_v22 = vmax.f32 %v4255_v47, 0.0  ;;  %v4290_v47 = vld [vmem:[#allocation26_spill] sm:$0xff] }
 0x1e4   : > { %v1886_v1 = vadd.f32 %v1885_v55, %v4232_v14  ;;  %v4258_v55 = vmax.f32 %v4257_v2, 0.0  ;;  %v4292_v2 = vld [vmem:[#allocation27_spill] sm:$0xff] }
 0x1e6   : > { %v1887_v30 = vadd.f32 %v1886_v1, %v4233_v36  ;;  %v4260_v1 = vmax.f32 %v4259_v51, 0.0 }
 0x1e8   : > { %v1888_v6 = vadd.f32 %v1887_v30, %v4234_v3  ;;  %v4262_v30 = vmax.f32 %v4261_v26, 0.0 }
 0x1ea   : > { %v1889_v25 = vadd.f32 %v1888_v6, %v4235_v16  ;;  %v4264_v6 = vmax.f32 %v4263_v29, 0.0 }
 0x1ec   : > { %v1890_v19 = vadd.f32 %v1889_v25, %v4236_v57  ;;  %v4266_v25 = vmax.f32 %v4265_v9, 0.0 }
 0x1ee   : > { %v1891_v15 = vadd.f32 %v1890_v19, %v4237_v13  ;;  %v4267_v19 = vld [vmem:[#allocation17_spill] sm:$0xff] }
 0x1ef   : > { %v4268_v13 = vmax.f32 %v4267_v19, 0.0 }
 0x1f0   : > { %v1892_v23 = vadd.f32 %v1891_v15, %v4238_v54  ;;  %v4269_v54 = vld [vmem:[#allocation14_spill] sm:$0xff] }
 0x1f2   : > { %v1893_v28 = vadd.f32 %v1892_v23, %v4239_v10  ;;  %v4270_v23 = vmax.f32 %v4269_v54, 0.0 }
 0x1f4   : > { %v1894_v45 = vadd.f32 %v1893_v28, %v4240_v48  ;;  %v4271_v28 = vld [vmem:[#allocation16_spill] sm:$0xff] }
 0x1f5   : > { %v4272_v48 = vmax.f32 %v4271_v28, 0.0 }
 0x1f6   : > { %v1895_v50 = vadd.f32 %v1894_v45, %v4241_v7  ;;  %v4273_v7 = vld [vmem:[#allocation19_spill] sm:$0xff] }
 0x1f8   : > { %v1896_v59 = vadd.f32 %v1895_v50, %v4242_v62  ;;  %v4274_v50 = vmax.f32 %v4273_v7, 0.0 }
 0x1fa   : > { %v1897_v60 = vadd.f32 %v1896_v59, %v4243_v39  ;;  %v4275_v59 = vld [vmem:[#allocation21_spill] sm:$0xff] }
 0x1fb   : > { %v4276_v39 = vmax.f32 %v4275_v59, 0.0 }
 0x1fc   : > { %v1898_v53 = vadd.f32 %v1897_v60, %v4244_v52  ;;  %v4277_v52 = vld [vmem:[#allocation18_spill] sm:$0xff] }
 0x1fe   : > { %v1899_v33 = vadd.f32 %v1898_v53, %v4245_v38  ;;  %v4278_v53 = vmax.f32 %v4277_v52, 0.0 }
 0x200   : > { %v1900_v34 = vadd.f32 %v1899_v33, %v4246_v44  ;;  %v4279_v33 = vld [vmem:[#allocation20_spill] sm:$0xff] }
 0x201   : > { %v4280_v44 = vmax.f32 %v4279_v33, 0.0 }
 0x202   : > { %v1901_v49 = vadd.f32 %v1900_v34, %v4247_v4  ;;  %v4281_v4 = vld [vmem:[#allocation23_spill] sm:$0xff] }
 0x204   : > { %v1902_v42 = vadd.f32 %v1901_v49, %v4248_v43  ;;  %v4282_v49 = vmax.f32 %v4281_v4, 0.0 }
 0x206   : > { %v1903_v8 = vadd.f32 %v1902_v42, %v4249_v40  ;;  %v4283_v42 = vld [vmem:[#allocation25_spill] sm:$0xff] }
 0x207   : > { %v4284_v40 = vmax.f32 %v4283_v42, 0.0 }
 0x208   : > { %v1904_v24 = vadd.f32 %v1903_v8, %v4250_v18  ;;  %v4285_v18 = vld [vmem:[#allocation22_spill] sm:$0xff] }
 0x20a   : > { %v1905_v56 = vadd.f32 %v1904_v24, %v4251_v46  ;;  %v4286_v24 = vmax.f32 %v4285_v18, 0.0 }
 0x20c   : > { %v1906_v31 = vadd.f32 %v1905_v56, %v4252_v32  ;;  %v4287_v56 = vld [vmem:[#allocation24_spill] sm:$0xff] }
 0x20d   : > { %v4288_v32 = vmax.f32 %v4287_v56, 0.0 }
 0x20e   : > { %v1907_v21 = vadd.f32 %v1906_v31, %v4254_v27 }
 0x210   : > { %v1908_v37 = vadd.f32 %v1907_v21, %v4256_v22  ;;  %v4291_v22 = vmax.f32 %v4290_v47, 0.0 }
 0x212   : > { %v1909_v14 = vadd.f32 %v1908_v37, %v4258_v55  ;;  %v4293_v55 = vmax.f32 %v4292_v2, 0.0 }
 0x214   : > { %v1910_v36 = vadd.f32 %v1909_v14, %v4260_v1 }
 0x216   : > { %v1911_v3 = vadd.f32 %v1910_v36, %v4262_v30 }
 0x218   : > { %v1912_v16 = vadd.f32 %v1911_v3, %v4264_v6 }
 0x21a   : > { %v1913_v57 = vadd.f32 %v1912_v16, %v4266_v25 }
 0x21c   : > { %v1914_v15 = vadd.f32 %v1913_v57, %v4268_v13 }
 0x21e   : > { %v1915_v10 = vadd.f32 %v1914_v15, %v4270_v23 }
 0x220   : > { %v1916_v45 = vadd.f32 %v1915_v10, %v4272_v48 }
 0x222   : > { %v1917_v62 = vadd.f32 %v1916_v45, %v4274_v50 }
 0x224   : > { %v1918_v60 = vadd.f32 %v1917_v62, %v4276_v39 }
 0x226   : > { %v1919_v38 = vadd.f32 %v1918_v60, %v4278_v53 }
 0x228   : > { %v1920_v34 = vadd.f32 %v1919_v38, %v4280_v44 }
 0x22a   : > { %v1921_v43 = vadd.f32 %v1920_v34, %v4282_v49 }
 0x22c   : > { %v1922_v8 = vadd.f32 %v1921_v43, %v4284_v40 }
 0x22e   : > { %v1923_v46 = vadd.f32 %v1922_v8, %v4286_v24 }
 0x230   : > { %v1924_v31 = vadd.f32 %v1923_v46, %v4288_v32 }
 0x232   : > { %v1925_v27 = vadd.f32 %v1924_v31, %v4289_v5 }
 0x234   : > { %v1926_v21 = vadd.f32 %v1925_v27, %v1159_v58 }
 0x236   : > { %v1927_v37 = vadd.f32 %v1926_v21, %v4291_v22 }
 0x238   : > { %v1928_v14 = vadd.f32 %v1927_v37, %v4293_v55 }
 0x23a   : > { %v1929_v51 = vadd.f32 %v1928_v14, %v1162_v41 }
 0x23c   : > { %v1930_v1 = vadd.f32 %v1929_v51, %v1163_v63 }
 0x23e   : > { %v1931_v36 = vadd.f32 %v1930_v1, %v1164_v35 }
 0x240   : > { %v1932_v0 = vadd.f32 %v1931_v36, %v4294_v17 }
 0x242   : > { %v1933_v58 = vrot.slane %v1932_v0, 4 }
 0x244   : > { %v1934_v26 = vadd.f32 %v1933_v58, %v1932_v0 }
 0x246   : > { %v1935_v30 = vrot.slane %v1934_v26, 2 }
 0x248   : > { %v1936_v3 = vadd.f32 %v1935_v30, %v1934_v26 }
 0x24a   : > { %v1937_v29 = vrot.slane %v1936_v3, 1 }
 0x24c   : > { %v1938_v61 = vadd.f32 %v1937_v29, %v1936_v3 }
 0x24e   : > { %1939 = vst [vmem:[%s228_s5] sm:$0xff] %v1938_v61 }
 0x24f PF: > { %s1976_s6 = sand.u32 1, %s3098_s15   ;;  %p4295_p8 = scmp.ne.s32.totalorder %s4185_s28, 0 }
 0x250   : > { %p4296_p10 = scmp.ge.s32.totalorder %s3110_s18, 2  ;;  %s1977_s7 = scalar_lea.sflag [#allocation4], %s1976_s6 }
 0x252   : > { %p2964_p0 = pnand %p4296_p10, %p4295_p8 }
 0x254   : > { %3093 = dma.done.wait (!%p2964_p0), %s1977_s7, 8192  }
 0x255   : > { %3095 = vsyncadd (!%p2964_p0), %s1977_s7, 4294959104  ;;  %p18_p2 = scmp.ge.s32.totalorder %s3168_s21, 4   ;;  %s4297_s15 = smov %s3102_s16 }
 0x256   : > { %s4298_s16 = smov %s3106_s17  ;;  %s4299_s17 = smov %s3180_s24 }
 0x257   : > { %s4300_s18 = smov %s3168_s21  ;;  %20 = sbr.rel (!%p18_p2) target bundleno = 5 (0x5), region = 89 }
 0x25e   :  { %1989 = vsyncpa [#allocation3], 1 }
 0x25f   :  { %1991 = vsyncpa [#allocation3 + $0x1], 1 }
 0x260   :  { %1992 = vsyncpa [#allocation4], 1 }
 0x261   :  { %1994 = vsyncpa [#allocation4 + $0x1], 1 }

</bundles_post_ra>
